<compile_context>
chip_gen: v7x
topology: tpu7x:2x2x1
jax: 0.10.0
libtpu: 0.0.40
codegen_flags: <defaults>
</compile_context>

<pallas_src>
import jax
import jax.numpy as jnp
from jax.experimental import pallas as pl
from jax.experimental.pallas import tpu as pltpu

H1, H2, OUT_PAD = 512, 256, 128   # hidden sizes; final layer padded 1 -> 128 lanes


def _round_up(x, m):
    return ((x + m - 1) // m) * m


# --------------------------- kernels ---------------------------

def _disc_kernel(x_ref, w1_ref, b1_ref, w2_ref, b2_ref, w3_ref, b3_ref, out_ref):
    """Monolithic path: whole feature dim D resident; 3 fused matmuls."""
    # Layer 1: cast f32 activations to bf16 in-kernel, f32 MXU accumulation.
    x = x_ref[...].astype(jnp.bfloat16)
    h = jnp.dot(x, w1_ref[...], preferred_element_type=jnp.float32) + b1_ref[...]
    h = jnp.maximum(h, 0.2 * h)                       # LeakyReLU(0.2)
    # Layer 2
    h = jnp.dot(h.astype(jnp.bfloat16), w2_ref[...],
                preferred_element_type=jnp.float32) + b2_ref[...]
    h = jnp.maximum(h, 0.2 * h)
    # Layer 3 (padded to 128 lanes -> unmasked lane-dense store)
    out = jnp.dot(h.astype(jnp.bfloat16), w3_ref[...],
                  preferred_element_type=jnp.float32) + b3_ref[...]
    out_ref[...] = out.astype(out_ref.dtype)


def _disc_kernel_ktiled(x_ref, w1_ref, b1_ref, w2_ref, b2_ref, w3_ref, b3_ref,
                        out_ref, acc_ref):
    """K-tiled path: layer-1 reduction over a D grid axis into a VMEM accumulator."""
    k = pl.program_id(1)

    @pl.when(k == 0)
    def _():
        acc_ref[...] = jnp.zeros_like(acc_ref)

    x = x_ref[...].astype(jnp.bfloat16)
    acc_ref[...] += jnp.dot(x, w1_ref[...], preferred_element_type=jnp.float32)

    @pl.when(k == pl.num_programs(1) - 1)
    def _():
        h = acc_ref[...] + b1_ref[...]
        h = jnp.maximum(h, 0.2 * h)                   # LeakyReLU(0.2)
        h = jnp.dot(h.astype(jnp.bfloat16), w2_ref[...],
                    preferred_element_type=jnp.float32) + b2_ref[...]
        h = jnp.maximum(h, 0.2 * h)
        out = jnp.dot(h.astype(jnp.bfloat16), w3_ref[...],
                      preferred_element_type=jnp.float32) + b3_ref[...]
        out_ref[...] = out.astype(out_ref.dtype)


# --------------------------- wrappers ---------------------------

def prepare_params(params):
    """One-time conversion of f32 params -> MXU-ready operands.

    Cache the result across training steps so the f32->bf16 converts and the
    width-1 -> width-128 padding of the final layer don't repeat every call.
    """
    w1 = params["w1"]
    d = w1.shape[0]
    d_pad = _round_up(d, 128)
    if d_pad != d:
        w1 = jnp.pad(w1, ((0, d_pad - d), (0, 0)))    # zero rows: no-op contribution
    w3 = jnp.pad(params["w3"], ((0, 0), (0, OUT_PAD - params["w3"].shape[1])))
    b3 = jnp.pad(params["b3"], ((0, 0), (0, OUT_PAD - params["b3"].shape[1])))
    return {
        "w1": w1.astype(jnp.bfloat16),
        "b1": params["b1"].astype(jnp.float32),
        "w2": params["w2"].astype(jnp.bfloat16),
        "b2": params["b2"].astype(jnp.float32),
        "w3": w3.astype(jnp.bfloat16),
        "b3": b3.astype(jnp.float32),
    }


def discriminator_forward(img, prepared, *, max_batch_tile=512,
                          force_k_tiled=False, k_tile=None):
    """img: (B, C, H, W) float32; prepared: output of prepare_params()."""
    B = img.shape[0]
    x = img.reshape(B, -1).astype(jnp.float32)        # same as torch .view(B, -1)
    D = x.shape[1]
    D_pad = prepared["w1"].shape[0]
    if D_pad != D:                                     # feature dim padded to 128 lanes
        x = jnp.pad(x, ((0, 0), (0, D_pad - D)))

    # Batch tile: <=512 rows, >=2 grid steps once B >= 16 (v7x megacore),
    # padded tail at most one sublane granule per tile.
    b8 = _round_up(max(B, 1), 8)
    n_tiles = max(pl.cdiv(b8, max_batch_tile), 2 if b8 >= 16 else 1)
    tb = _round_up(pl.cdiv(b8, n_tiles), 8)
    B_pad = tb * n_tiles
    if B_pad != B:
        x = jnp.pad(x, ((0, B_pad - B), (0, 0)))

    w1, b1 = prepared["w1"], prepared["b1"]
    w2, b2 = prepared["w2"], prepared["b2"]
    w3, b3 = prepared["w3"], prepared["b3"]

    # FLOP / byte accounting (scheduler hint + VMEM limit).
    weight_bytes = (D_pad * H1 + H1 * H2 + H2 * OUT_PAD) * 2 + (H1 + H2 + OUT_PAD) * 4
    cost = pl.CostEstimate(
        flops=2 * B_pad * (D_pad * H1 + H1 * H2 + H2 * OUT_PAD),
        transcendentals=0,
        bytes_accessed=weight_bytes + B_pad * D_pad * 4 + B_pad * OUT_PAD * 4,
    )

    # Switch to the K-tiled layer-1 path when w1 alone exceeds ~8 MiB (large D,
    # e.g. RGB 64x64 -> D=12288) so the dominant weight DMA pipelines and the
    # resident footprint stays well inside v7x's 64 MiB VMEM.
    use_k_tiled = force_k_tiled or (D_pad * H1 * 2 > (8 << 20))

    if not use_k_tiled:
        # 2x on every input block: Pallas may double-buffer even constant-index weights.
        vmem_limit = (2 * weight_bytes
                      + 2 * tb * D_pad * 4 + 2 * tb * OUT_PAD * 4
                      + tb * (D_pad * 2 + (H1 + H2) * 6 + OUT_PAD * 4)
                      + (8 << 20))
        out_full = pl.pallas_call(
            _disc_kernel,
            out_shape=jax.ShapeDtypeStruct((B_pad, OUT_PAD), jnp.float32),
            grid=(n_tiles,),
            in_specs=[
                pl.BlockSpec((tb, D_pad), lambda i: (i, 0)),    # activation tile (f32)
                pl.BlockSpec((D_pad, H1), lambda i: (0, 0)),    # resident weights
                pl.BlockSpec((1, H1), lambda i: (0, 0)),
                pl.BlockSpec((H1, H2), lambda i: (0, 0)),
                pl.BlockSpec((1, H2), lambda i: (0, 0)),
                pl.BlockSpec((H2, OUT_PAD), lambda i: (0, 0)),
                pl.BlockSpec((1, OUT_PAD), lambda i: (0, 0)),
            ],
            out_specs=pl.BlockSpec((tb, OUT_PAD), lambda i: (i, 0)),
            compiler_params=pltpu.CompilerParams(
                dimension_semantics=("parallel",),
                vmem_limit_bytes=min(vmem_limit, 64 << 20),
            ),
            cost_estimate=cost,
        )(x, w1, b1, w2, b2, w3, b3)
    else:
        if k_tile is None:
            k_tile = next(t for t in (1024, 512, 256, 128) if D_pad % t == 0)
        assert D_pad % k_tile == 0
        vmem_limit = (2 * (k_tile * H1 * 2
                           + (H1 * H2 + H2 * OUT_PAD) * 2
                           + (H1 + H2 + OUT_PAD) * 4)
                      + 2 * tb * k_tile * 4 + 2 * tb * OUT_PAD * 4
                      + tb * (k_tile * 2 + (H1 + H2) * 6 + OUT_PAD * 4)
                      + tb * H1 * 4                       # f32 accumulator scratch
                      + (8 << 20))
        out_full = pl.pallas_call(
            _disc_kernel_ktiled,
            out_shape=jax.ShapeDtypeStruct((B_pad, OUT_PAD), jnp.float32),
            grid=(n_tiles, D_pad // k_tile),
            in_specs=[
                pl.BlockSpec((tb, k_tile), lambda i, k: (i, k)),   # x K-slice
                pl.BlockSpec((k_tile, H1), lambda i, k: (k, 0)),   # w1 K-slice
                pl.BlockSpec((1, H1), lambda i, k: (0, 0)),
                pl.BlockSpec((H1, H2), lambda i, k: (0, 0)),
                pl.BlockSpec((1, H2), lambda i, k: (0, 0)),
                pl.BlockSpec((H2, OUT_PAD), lambda i, k: (0, 0)),
                pl.BlockSpec((1, OUT_PAD), lambda i, k: (0, 0)),
            ],
            out_specs=pl.BlockSpec((tb, OUT_PAD), lambda i, k: (i, 0)),
            scratch_shapes=[pltpu.VMEM((tb, H1), jnp.float32)],
            compiler_params=pltpu.CompilerParams(
                dimension_semantics=("parallel", "arbitrary"),
                vmem_limit_bytes=min(vmem_limit, 64 << 20),
            ),
            cost_estimate=cost,
        )(x, w1, b1, w2, b2, w3, b3)

    return out_full[:B, :1]


# --------------------------- init / reference ---------------------------

def init_params(key, in_features):
    """torch.nn.Linear default init: U[-1/sqrt(fan_in), 1/sqrt(fan_in)]."""
    def linear(key, fan_in, fan_out):
        kw, kb = jax.random.split(key)
        bound = 1.0 / jnp.sqrt(fan_in)
        w = jax.random.uniform(kw, (fan_in, fan_out), jnp.float32, -bound, bound)
        b = jax.random.uniform(kb, (1, fan_out), jnp.float32, -bound, bound)
        return w, b

    k1, k2, k3 = jax.random.split(key, 3)
    w1, b1 = linear(k1, in_features, H1)
    w2, b2 = linear(k2, H1, H2)
    w3, b3 = linear(k3, H2, 1)
    return {"w1": w1, "b1": b1, "w2": w2, "b2": b2, "w3": w3, "b3": b3}


def _reference_forward(img, params):
    """Pure-JAX reference with the same bf16-operand / f32-accumulate recipe."""
    x = img.reshape(img.shape[0], -1).astype(jnp.bfloat16)
    w1 = params["w1"].astype(jnp.bfloat16)
    w2 = params["w2"].astype(jnp.bfloat16)
    w3 = params["w3"].astype(jnp.bfloat16)
    h = jnp.dot(x, w1, preferred_element_type=jnp.float32) + params["b1"]
    h = jnp.where(h > 0, h, 0.2 * h)
    h = jnp.dot(h.astype(jnp.bfloat16), w2, preferred_element_type=jnp.float32) + params["b2"]
    h = jnp.where(h > 0, h, 0.2 * h)
    return jnp.dot(h.astype(jnp.bfloat16), w3, preferred_element_type=jnp.float32) + params["b3"]


if __name__ == "__main__":
    # Small shapes consistent with the module: img_shape = (channels, img_size, img_size)
    B, C, HI, WI = 2, 4, 16, 16                 # in_features = 4*16*16 = 1024
    key = jax.random.PRNGKey(0)
    k_img, k_params = jax.random.split(key)

    img = jax.random.normal(k_img, (B, C, HI, WI), jnp.float32)
    params = init_params(k_params, C * HI * WI)
    prepared = prepare_params(params)           # cache this across training steps

    ref = _reference_forward(img, params)

    # Default (monolithic) path.
    out = discriminator_forward(img, prepared)
    out = jax.block_until_ready(out)
    assert out.shape == (B, 1)
    assert jnp.allclose(out, ref, atol=1e-2, rtol=1e-2), (out, ref)

    # Also exercise the K-tiled layer-1 path (auto-selected for large D).
    out_k = discriminator_forward(img, prepared, force_k_tiled=True, k_tile=256)
    out_k = jax.block_until_ready(out_k)
    assert jnp.allclose(out_k, ref, atol=1e-2, rtol=1e-2), (out_k, ref)

    print("KERNEL_OK")
</pallas_src>

<mosaic_0001>
module attributes {stable_mosaic.version = 11 : i64} {
  func.func @_disc_kernel(%arg0: i32, %arg1: memref<8x1024xf32, #tpu.memory_space<vmem>>, %arg2: memref<1024x512xbf16, #tpu.memory_space<vmem>>, %arg3: memref<1x512xf32, #tpu.memory_space<vmem>>, %arg4: memref<512x256xbf16, #tpu.memory_space<vmem>>, %arg5: memref<1x256xf32, #tpu.memory_space<vmem>>, %arg6: memref<256x128xbf16, #tpu.memory_space<vmem>>, %arg7: memref<1x128xf32, #tpu.memory_space<vmem>>, %arg8: memref<8x128xf32, #tpu.memory_space<vmem>>) attributes {dimension_semantics = [#tpu.dimension_semantics<parallel>], iteration_bounds = array<i64: 1>, scalar_prefetch = 0 : i64, scratch_operands = 0 : i64, tpu.core_type = #tpu.core_type<tc>, window_params = [{transform_indices = @transform_0, window_bounds = array<i64: 8, 1024>}, {pipeline_mode = #tpu.pipeline_mode<synchronous>, transform_indices = @transform_1, window_bounds = array<i64: 1024, 512>}, {pipeline_mode = #tpu.pipeline_mode<synchronous>, transform_indices = @transform_2, window_bounds = array<i64: 1, 512>}, {pipeline_mode = #tpu.pipeline_mode<synchronous>, transform_indices = @transform_3, window_bounds = array<i64: 512, 256>}, {pipeline_mode = #tpu.pipeline_mode<synchronous>, transform_indices = @transform_4, window_bounds = array<i64: 1, 256>}, {pipeline_mode = #tpu.pipeline_mode<synchronous>, transform_indices = @transform_5, window_bounds = array<i64: 256, 128>}, {pipeline_mode = #tpu.pipeline_mode<synchronous>, transform_indices = @transform_6, window_bounds = array<i64: 1, 128>}, {transform_indices = @transform_7, window_bounds = array<i64: 8, 128>}]} {
    %c0 = arith.constant 0 : index
    %c0_0 = arith.constant 0 : index
    %0 = vector.load %arg1[%c0, %c0_0] : memref<8x1024xf32, #tpu.memory_space<vmem>>, vector<8x1024xf32>
    %1 = arith.truncf %0 : vector<8x1024xf32> to vector<8x1024xbf16>
    %c0_1 = arith.constant 0 : index
    %c0_2 = arith.constant 0 : index
    %2 = vector.load %arg2[%c0_1, %c0_2] : memref<1024x512xbf16, #tpu.memory_space<vmem>>, vector<1024x512xbf16>
    %cst = arith.constant dense<0.000000e+00> : vector<8x512xf32>
    %3 = tpu.matmul %1, %2, %cst {dimension_numbers = #tpu.dot_dimension_numbers<[1], [0], [0], [1], [0, 0, 1, 1], [], []>} : vector<8x1024xbf16>, vector<1024x512xbf16>, vector<8x512xf32> -> vector<8x512xf32>
    %c0_3 = arith.constant 0 : index
    %c0_4 = arith.constant 0 : index
    %4 = vector.load %arg3[%c0_3, %c0_4] : memref<1x512xf32, #tpu.memory_space<vmem>>, vector<1x512xf32>
    %5 = vector.broadcast %4 : vector<1x512xf32> to vector<8x512xf32>
    %6 = arith.addf %3, %5 : vector<8x512xf32>
    %cst_5 = arith.constant 2.000000e-01 : f32
    %7 = vector.broadcast %cst_5 : f32 to vector<8x512xf32>
    %8 = arith.mulf %7, %6 : vector<8x512xf32>
    %9 = arith.maximumf %6, %8 : vector<8x512xf32>
    %10 = arith.truncf %9 : vector<8x512xf32> to vector<8x512xbf16>
    %c0_6 = arith.constant 0 : index
    %c0_7 = arith.constant 0 : index
    %11 = vector.load %arg4[%c0_6, %c0_7] : memref<512x256xbf16, #tpu.memory_space<vmem>>, vector<512x256xbf16>
    %cst_8 = arith.constant dense<0.000000e+00> : vector<8x256xf32>
    %12 = tpu.matmul %10, %11, %cst_8 {dimension_numbers = #tpu.dot_dimension_numbers<[1], [0], [0], [1], [0, 0, 1, 1], [], []>} : vector<8x512xbf16>, vector<512x256xbf16>, vector<8x256xf32> -> vector<8x256xf32>
    %c0_9 = arith.constant 0 : index
    %c0_10 = arith.constant 0 : index
    %13 = vector.load %arg5[%c0_9, %c0_10] : memref<1x256xf32, #tpu.memory_space<vmem>>, vector<1x256xf32>
    %14 = vector.broadcast %13 : vector<1x256xf32> to vector<8x256xf32>
    %15 = arith.addf %12, %14 : vector<8x256xf32>
    %cst_11 = arith.constant 2.000000e-01 : f32
    %16 = vector.broadcast %cst_11 : f32 to vector<8x256xf32>
    %17 = arith.mulf %16, %15 : vector<8x256xf32>
    %18 = arith.maximumf %15, %17 : vector<8x256xf32>
    %19 = arith.truncf %18 : vector<8x256xf32> to vector<8x256xbf16>
    %c0_12 = arith.constant 0 : index
    %c0_13 = arith.constant 0 : index
    %20 = vector.load %arg6[%c0_12, %c0_13] : memref<256x128xbf16, #tpu.memory_space<vmem>>, vector<256x128xbf16>
    %cst_14 = arith.constant dense<0.000000e+00> : vector<8x128xf32>
    %21 = tpu.matmul %19, %20, %cst_14 {dimension_numbers = #tpu.dot_dimension_numbers<[1], [0], [0], [1], [0, 0, 1, 1], [], []>} : vector<8x256xbf16>, vector<256x128xbf16>, vector<8x128xf32> -> vector<8x128xf32>
    %c0_15 = arith.constant 0 : index
    %c0_16 = arith.constant 0 : index
    %22 = vector.load %arg7[%c0_15, %c0_16] : memref<1x128xf32, #tpu.memory_space<vmem>>, vector<1x128xf32>
    %23 = vector.broadcast %22 : vector<1x128xf32> to vector<8x128xf32>
    %24 = arith.addf %21, %23 : vector<8x128xf32>
    %c0_17 = arith.constant 0 : index
    %c0_18 = arith.constant 0 : index
    %25 = vector.load %arg8[%c0_17, %c0_18] : memref<8x128xf32, #tpu.memory_space<vmem>>, vector<8x128xf32>
    tpu.vector_store %arg8[%c0_17, %c0_18], %24 {strides = array<i32>} : memref<8x128xf32, #tpu.memory_space<vmem>>, vector<8x128xf32>,
    return
  }
  func.func @transform_0(%arg0: i32) -> (i32, i32) {
    %c0_i32 = arith.constant 0 : i32
    %c0_i32_0 = arith.constant 0 : i32
    return %arg0, %c0_i32 : i32, i32
  }
  func.func @transform_1(%arg0: i32) -> (i32, i32) {
    %c0_i32 = arith.constant 0 : i32
    %c0_i32_0 = arith.constant 0 : i32
    %c0_i32_1 = arith.constant 0 : i32
    return %c0_i32, %c0_i32_0 : i32, i32
  }
  func.func @transform_2(%arg0: i32) -> (i32, i32) {
    %c0_i32 = arith.constant 0 : i32
    %c0_i32_0 = arith.constant 0 : i32
    %c0_i32_1 = arith.constant 0 : i32
    return %c0_i32, %c0_i32_0 : i32, i32
  }
  func.func @transform_3(%arg0: i32) -> (i32, i32) {
    %c0_i32 = arith.constant 0 : i32
    %c0_i32_0 = arith.constant 0 : i32
    %c0_i32_1 = arith.constant 0 : i32
    return %c0_i32, %c0_i32_0 : i32, i32
  }
  func.func @transform_4(%arg0: i32) -> (i32, i32) {
    %c0_i32 = arith.constant 0 : i32
    %c0_i32_0 = arith.constant 0 : i32
    %c0_i32_1 = arith.constant 0 : i32
    return %c0_i32, %c0_i32_0 : i32, i32
  }
  func.func @transform_5(%arg0: i32) -> (i32, i32) {
    %c0_i32 = arith.constant 0 : i32
    %c0_i32_0 = arith.constant 0 : i32
    %c0_i32_1 = arith.constant 0 : i32
    return %c0_i32, %c0_i32_0 : i32, i32
  }
  func.func @transform_6(%arg0: i32) -> (i32, i32) {
    %c0_i32 = arith.constant 0 : i32
    %c0_i32_0 = arith.constant 0 : i32
    %c0_i32_1 = arith.constant 0 : i32
    return %c0_i32, %c0_i32_0 : i32, i32
  }
  func.func @transform_7(%arg0: i32) -> (i32, i32) {
    %c0_i32 = arith.constant 0 : i32
    %c0_i32_0 = arith.constant 0 : i32
    return %arg0, %c0_i32 : i32, i32
  }
}

</mosaic_0001>

<bundles_post_ra>
// kernel: tpu_custom_call.1
= control target key start
LH: loop header
LB: loop body
LE: loop exit
PB: predicated region body
PF: predicated region fallthrough
CT: control target
= control target key end

     0   :  { %12 = vsyncpa [#allocation3], 0  ;;  %s3860_s0 = inlined_call_operand.hbm [shape: f32[8,1024], index: 0, kind: input, shape index: {}]   ;;  %s3861_s1 = inlined_call_operand.hbm [shape: bf16[1024,512], index: 1, kind: input, shape index: {}]   ;;  %s3862_s2 = inlined_call_operand.vmem [shape: f32[1,512], index: 2, kind: input, shape index: {}]   ;;  %s3863_s3 = inlined_call_operand.hbm [shape: bf16[512,256], index: 3, kind: input, shape index: {}]   ;;  %s3864_s4 = inlined_call_operand.vmem [shape: f32[1,256], index: 4, kind: input, shape index: {}]   ;;  %s3865_s5 = inlined_call_operand.hbm [shape: bf16[256,128], index: 5, kind: input, shape index: {}]   ;;  %s3866_s6 = inlined_call_operand.vmem [shape: f32[1,128], index: 6, kind: input, shape index: {}]   ;;  %s3867_s7 = inlined_call_operand.hbm [shape: f32[8,128], index: 7, kind: output, shape index: {}]  }
   0x1   :  { %13 = vsyncpa [#allocation6], 0 }
   0x2   :  { %14 = vsyncpa [#allocation9], 0 }
   0x3   :  { %15 = vsyncpa [#allocation4], 0  ;;  %s3688_s24 = smov [#allocation5]   ;;  %s3570_s28 = scalar_lea.hbm %s3861_s1, 32768 }
   0x4   :  { %s31_s25 = sshll.u32 %s3688_s24, 4  ;;  %p3571_p0 = scmp.ne.s32.totalorder %s3861_s1, %s3570_s28  ;;  %s32_s25 = int_to_ptr.vmem [resolvable:$true] %s31_s25 }
   0x5   :  { %p3574_p1 = scmp.lt.u32.totalorder %s3570_s28, %s3861_s1 }
   0x7   :  { %p3576_p2 = pnand %p3574_p1, %p3571_p0 }
   0x9   :  { %3579 = shalt.err (!%p3576_p2)
}
   0xa   :  { %s3580_s10 = scalar_lea.vmem %s32_s25, 32768  ;;  %p3585_p4 = scmp.lt.s32.totalorder %s32_s25, %s32_s25 }
   0xb   :  { %p3581_p3 = scmp.ne.s32.totalorder %s32_s25, %s3580_s10  ;;  %p3586_p5 = scmp.lt.s32.totalorder %s3580_s10, %s3580_s10 }
   0xd   :  { %p3587_p6 = por %p3586_p5, %p3585_p4 }
   0xf   :  { %p3588_p7 = pnand %p3587_p6, %p3581_p3 }
  0x11   :  { %3591 = shalt.err (!%p3588_p7)
}
  0x12   :  { %s3689_s11 = smov 256   ;;  %s3690_s12 = smov 16  }
  0x13   :  { %37 = dma.hbm_to_vmem [thread:$0]  %s3861_s1, 32768, %s32_s25, [#allocation6], %s3689_s11, %s3689_s11, %s3690_s12  }
  0x14   :  { %s3691_s15 = smov [#allocation2]   ;;  %s3692_s17 = smov [#allocation7]  }
  0x15   :  { %s22_s16 = sshll.u32 %s3691_s15, 4  ;;  %s45_s18 = sshll.u32 %s3692_s17, 4  ;;  %s23_s16 = int_to_ptr.vmem [resolvable:$true] %s22_s16  ;;  %s46_s18 = int_to_ptr.vmem [resolvable:$true] %s45_s18 }
  0x16   :  { %s3592_s21 = scalar_lea.hbm %s3860_s0, 1024 }
  0x17   :  { %p3593_p8 = scmp.ne.s32.totalorder %s3860_s0, %s3592_s21  ;;  %p3596_p9 = scmp.lt.u32.totalorder %s3592_s21, %s3860_s0 }
  0x19   :  { %p3598_p10 = pnand %p3596_p9, %p3593_p8 }
  0x1b   :  { %3601 = shalt.err (!%p3598_p10)
}
  0x1c   :  { %s3602_s1 = scalar_lea.vmem %s23_s16, 1024  ;;  %p3607_p12 = scmp.lt.s32.totalorder %s23_s16, %s23_s16 }
  0x1d   :  { %p3603_p11 = scmp.ne.s32.totalorder %s23_s16, %s3602_s1  ;;  %p3608_p13 = scmp.lt.s32.totalorder %s3602_s1, %s3602_s1 }
  0x1f   :  { %p3609_p0 = por %p3608_p13, %p3607_p12 }
  0x21   :  { %p3610_p1 = pnand %p3609_p0, %p3603_p11 }
  0x23   :  { %3613 = shalt.err (!%p3610_p1)
}
  0x24   :  { %25 = dma.hbm_to_vmem [thread:$0]  %s3860_s0, 1024, %s23_s16, [#allocation3]  }
  0x25   :  { %s3614_s30 = scalar_lea.hbm %s3863_s3, 8192 }
  0x26   :  { %p3615_p2 = scmp.ne.s32.totalorder %s3863_s3, %s3614_s30  ;;  %p3618_p3 = scmp.lt.u32.totalorder %s3614_s30, %s3863_s3 }
  0x28   :  { %p3620_p4 = pnand %p3618_p3, %p3615_p2 }
  0x2a   :  { %3623 = shalt.err (!%p3620_p4)
}
  0x2b   :  { %s3624_s12 = scalar_lea.vmem %s46_s18, 8192  ;;  %p3629_p6 = scmp.lt.s32.totalorder %s46_s18, %s46_s18 }
  0x2c   :  { %p3625_p5 = scmp.ne.s32.totalorder %s46_s18, %s3624_s12  ;;  %p3630_p7 = scmp.lt.s32.totalorder %s3624_s12, %s3624_s12 }
  0x2e   :  { %p3631_p8 = por %p3630_p7, %p3629_p6 }
  0x30   :  { %p3632_p9 = pnand %p3631_p8, %p3625_p5 }
  0x32   :  { %3635 = shalt.err (!%p3632_p9)
}
  0x33   :  { %s3693_s0 = smov 128   ;;  %s3694_s13 = smov 8  }
  0x34   :  { %51 = dma.hbm_to_vmem [thread:$0]  %s3863_s3, 8192, %s46_s18, [#allocation6], %s3693_s0, %s3693_s0, %s3694_s13  }
  0x35   :  { %s3695_s16 = smov [#allocation8]   ;;  %s3636_s21 = scalar_lea.hbm %s3865_s5, 2048 }
  0x36   :  { %s59_s17 = sshll.u32 %s3695_s16, 4  ;;  %p3637_p10 = scmp.ne.s32.totalorder %s3865_s5, %s3636_s21  ;;  %s60_s17 = int_to_ptr.vmem [resolvable:$true] %s59_s17 }
  0x37   :  { %p3640_p11 = scmp.lt.u32.totalorder %s3636_s21, %s3865_s5 }
  0x39   :  { %p3642_p12 = pnand %p3640_p11, %p3637_p10 }
  0x3b   :  { %3645 = shalt.err (!%p3642_p12)
}
  0x3c   :  { %s3646_s1 = scalar_lea.vmem %s60_s17, 2048  ;;  %p3651_p0 = scmp.lt.s32.totalorder %s60_s17, %s60_s17 }
  0x3d   :  { %p3647_p13 = scmp.ne.s32.totalorder %s60_s17, %s3646_s1  ;;  %p3652_p1 = scmp.lt.s32.totalorder %s3646_s1, %s3646_s1 }
  0x3f   :  { %p3653_p2 = por %p3652_p1, %p3651_p0 }
  0x41   :  { %p3654_p3 = pnand %p3653_p2, %p3647_p13 }
  0x43   :  { %3657 = shalt.err (!%p3654_p3)
}
  0x44   :  { %s3696_s3 = smov 64   ;;  %s3697_s18 = smov 4  }
  0x45   :  { %65 = dma.hbm_to_vmem [thread:$0]  %s3865_s5, 2048, %s60_s17, [#allocation9], %s3696_s3, %s3696_s3, %s3697_s18  }
  0x46   :  { %3680 = dma.done.wait [#allocation3], 1024  }
  0x47   :  { %3681 = vsyncadd [#allocation3], 4294966272 }
  0x48   :  { %3682 = dma.done.wait [#allocation6], 40960  }
  0x49   :  { %3683 = vsyncadd [#allocation6], 4294926336 }
  0x4a   :  { %3684 = dma.done.wait [#allocation9], 2048  }
  0x4b   :  { %3685 = vsyncadd [#allocation9], 4294965248  ;;  %v3074_v0 = vld [vmem:[#allocation5 + $0x4] ss:$16 sps:$4 sm:$0xff]   ;;  %v3078_v2 = vld [vmem:[#allocation5] ss:$16 sps:$4 sm:$0xff]  }
  0x4c   :  { %v3076_v1 = vld [vmem:[#allocation5 + $0x204] ss:$16 sps:$4 sm:$0xff]   ;;  %1655 = vmatprep.subr.bf16.mxu1 %v3074_v0  ;;  %v3079_v3 = vld [vmem:[#allocation5 + $0x200] ss:$16 sps:$4 sm:$0xff]   ;;  %v82_v46 = vld [vmem:[#allocation2 + $0x8] sm:$0xff]  ;;  %s3698_s8 = smov [#allocation10]  }
  0x4d   :  { %1696 = vmatprep.subr.bf16.mxu0 %v3076_v1  ;;  %v3080_v4 = vld [vmem:[#allocation5 + $0x24] ss:$16 sps:$4 sm:$0xff]   ;;  %1656 = vmatpush1.bf16.msra.mxu1 %v3078_v2  ;;  %v3084_v6 = vld [vmem:[#allocation5 + $0x20] ss:$16 sps:$4 sm:$0xff]   ;;  %v3787_v48 = vpack.c.bf16 %v82_v46, %v82_v46  ;;  %v84_v49 = vld [vmem:[#allocation2 + $0x18] sm:$0xff]  ;;  %s2661_s9 = sshll.u32 %s3698_s8, 4  ;;  %s2662_s9 = int_to_ptr.vmem [resolvable:$true] %s2661_s9 }
  0x4e   :  { %1697 = vmatpush1.bf16.msra.mxu0 %v3079_v3  ;;  %v3082_v5 = vld [vmem:[#allocation5 + $0x224] ss:$16 sps:$4 sm:$0xff]   ;;  %1657 = vmatprep.subr.bf16.mxu1 %v3080_v4  ;;  %v3085_v7 = vld [vmem:[#allocation5 + $0x220] ss:$16 sps:$4 sm:$0xff]   ;;  %v3789_v52 = vpack.c.bf16 %v84_v49, %v84_v49  ;;  %v3227_v49 = vld [vmem:[#allocation5 + $0x128] ss:$16 sps:$4 sm:$0xff]   ;;  %p3663_p5 = scmp.lt.s32.totalorder %s2662_s9, %s2662_s9 }
  0x4f   :  { %1698 = vmatprep.subr.bf16.mxu0 %v3082_v5  ;;  %v3086_v8 = vld [vmem:[#allocation5 + $0x44] ss:$16 sps:$4 sm:$0xff]   ;;  %v3090_v10 = vld [vmem:[#allocation5 + $0x40] ss:$16 sps:$4 sm:$0xff]   ;;  %1687 = vmatprep.mubr.bf16.mxu1 %v3787_v48  ;;  %s3658_s10 = scalar_lea.vmem %s2662_s9, 128 }
  0x50   :  { %v3088_v9 = vld [vmem:[#allocation5 + $0x244] ss:$16 sps:$4 sm:$0xff]   ;;  %v3091_v11 = vld [vmem:[#allocation5 + $0x240] ss:$16 sps:$4 sm:$0xff]   ;;  %1728 = vmatprep.mubr.bf16.mxu0 %v3789_v52  ;;  %p3659_p4 = scmp.ne.s32.totalorder %s2662_s9, %s3658_s10  ;;  %p3664_p6 = scmp.lt.s32.totalorder %s3658_s10, %s3658_s10 }
  0x51   :  { %1658 = vmatpush1.bf16.msra.mxu1 %v3084_v6  ;;  %v3092_v12 = vld [vmem:[#allocation5 + $0x64] ss:$16 sps:$4 sm:$0xff]   ;;  %v3096_v14 = vld [vmem:[#allocation5 + $0x60] ss:$16 sps:$4 sm:$0xff]  }
  0x52   :  { %1699 = vmatpush1.bf16.msra.mxu0 %v3085_v7  ;;  %1659 = vmatprep.subr.bf16.mxu1 %v3086_v8  ;;  %v3094_v13 = vld [vmem:[#allocation5 + $0x264] ss:$16 sps:$4 sm:$0xff]   ;;  %v3097_v15 = vld [vmem:[#allocation5 + $0x260] ss:$16 sps:$4 sm:$0xff]   ;;  %v3175_v7 = vld [vmem:[#allocation5 + $0xc] ss:$16 sps:$4 sm:$0xff]   ;;  %p3665_p7 = por %p3664_p6, %p3663_p5 }
  0x53   :  { %1700 = vmatprep.subr.bf16.mxu0 %v3088_v9  ;;  %v3098_v16 = vld [vmem:[#allocation5 + $0x84] ss:$16 sps:$4 sm:$0xff]   ;;  %v3102_v18 = vld [vmem:[#allocation5 + $0x80] ss:$16 sps:$4 sm:$0xff]  }
  0x54   :  { %v3100_v17 = vld [vmem:[#allocation5 + $0x284] ss:$16 sps:$4 sm:$0xff]   ;;  %v3103_v19 = vld [vmem:[#allocation5 + $0x280] ss:$16 sps:$4 sm:$0xff]   ;;  %p3666_p8 = pnand %p3665_p7, %p3659_p4 }
  0x55   :  { %1660 = vmatpush1.bf16.msra.mxu1 %v3090_v10  ;;  %v3104_v20 = vld [vmem:[#allocation5 + $0xa4] ss:$16 sps:$4 sm:$0xff]   ;;  %v3108_v22 = vld [vmem:[#allocation5 + $0xa0] ss:$16 sps:$4 sm:$0xff]   ;;  %v3173_v10 = vld [vmem:[#allocation5 + $0x8] ss:$16 sps:$4 sm:$0xff]  }
  0x56   :  { %1701 = vmatpush1.bf16.msra.mxu0 %v3091_v11  ;;  %1661 = vmatprep.subr.bf16.mxu1 %v3092_v12  ;;  %v3106_v21 = vld [vmem:[#allocation5 + $0x2a4] ss:$16 sps:$4 sm:$0xff]   ;;  %v3109_v23 = vld [vmem:[#allocation5 + $0x2a0] ss:$16 sps:$4 sm:$0xff]  }
  0x57   :  { %1702 = vmatprep.subr.bf16.mxu0 %v3094_v13  ;;  %v3110_v24 = vld [vmem:[#allocation5 + $0xc4] ss:$16 sps:$4 sm:$0xff]   ;;  %v3114_v26 = vld [vmem:[#allocation5 + $0xc0] ss:$16 sps:$4 sm:$0xff]   ;;  %v3181_v13 = vld [vmem:[#allocation5 + $0x2c] ss:$16 sps:$4 sm:$0xff]  }
  0x58   :  { %v3112_v25 = vld [vmem:[#allocation5 + $0x2c4] ss:$16 sps:$4 sm:$0xff]   ;;  %v3115_v27 = vld [vmem:[#allocation5 + $0x2c0] ss:$16 sps:$4 sm:$0xff]  }
  0x59   :  { %1662 = vmatpush1.bf16.msra.mxu1 %v3096_v14  ;;  %v3116_v28 = vld [vmem:[#allocation5 + $0xe4] ss:$16 sps:$4 sm:$0xff]   ;;  %v3120_v30 = vld [vmem:[#allocation5 + $0xe0] ss:$16 sps:$4 sm:$0xff]  }
  0x5a   :  { %1703 = vmatpush1.bf16.msra.mxu0 %v3097_v15  ;;  %1663 = vmatprep.subr.bf16.mxu1 %v3098_v16  ;;  %v3118_v29 = vld [vmem:[#allocation5 + $0x2e4] ss:$16 sps:$4 sm:$0xff]   ;;  %v3121_v31 = vld [vmem:[#allocation5 + $0x2e0] ss:$16 sps:$4 sm:$0xff]   ;;  %v3179_v15 = vld [vmem:[#allocation5 + $0x28] ss:$16 sps:$4 sm:$0xff]  }
  0x5b   :  { %1704 = vmatprep.subr.bf16.mxu0 %v3100_v17  ;;  %v3122_v32 = vld [vmem:[#allocation5 + $0x104] ss:$16 sps:$4 sm:$0xff]   ;;  %v3126_v34 = vld [vmem:[#allocation5 + $0x100] ss:$16 sps:$4 sm:$0xff]   ;;  %v3187_v17 = vld [vmem:[#allocation5 + $0x4c] ss:$16 sps:$4 sm:$0xff]  }
  0x5c   :  { %v3124_v33 = vld [vmem:[#allocation5 + $0x304] ss:$16 sps:$4 sm:$0xff]   ;;  %v3127_v35 = vld [vmem:[#allocation5 + $0x300] ss:$16 sps:$4 sm:$0xff]  }
  0x5d   :  { %1664 = vmatpush1.bf16.msra.mxu1 %v3102_v18  ;;  %v3128_v36 = vld [vmem:[#allocation5 + $0x124] ss:$16 sps:$4 sm:$0xff]   ;;  %v3132_v38 = vld [vmem:[#allocation5 + $0x120] ss:$16 sps:$4 sm:$0xff]  }
  0x5e   :  { %1705 = vmatpush1.bf16.msra.mxu0 %v3103_v19  ;;  %1665 = vmatprep.subr.bf16.mxu1 %v3104_v20  ;;  %v3130_v37 = vld [vmem:[#allocation5 + $0x324] ss:$16 sps:$4 sm:$0xff]   ;;  %v3133_v39 = vld [vmem:[#allocation5 + $0x320] ss:$16 sps:$4 sm:$0xff]   ;;  %v3185_v19 = vld [vmem:[#allocation5 + $0x48] ss:$16 sps:$4 sm:$0xff]  }
  0x5f   :  { %1706 = vmatprep.subr.bf16.mxu0 %v3106_v21  ;;  %v3134_v40 = vld [vmem:[#allocation5 + $0x144] ss:$16 sps:$4 sm:$0xff]   ;;  %v3138_v42 = vld [vmem:[#allocation5 + $0x140] ss:$16 sps:$4 sm:$0xff]   ;;  %v3193_v21 = vld [vmem:[#allocation5 + $0x6c] ss:$16 sps:$4 sm:$0xff]  }
  0x60   :  { %v3136_v41 = vld [vmem:[#allocation5 + $0x344] ss:$16 sps:$4 sm:$0xff]   ;;  %v3139_v43 = vld [vmem:[#allocation5 + $0x340] ss:$16 sps:$4 sm:$0xff]  }
  0x61   :  { %1666 = vmatpush1.bf16.msra.mxu1 %v3108_v22  ;;  %v3140_v44 = vld [vmem:[#allocation5 + $0x164] ss:$16 sps:$4 sm:$0xff]   ;;  %v3144_v47 = vld [vmem:[#allocation5 + $0x160] ss:$16 sps:$4 sm:$0xff]  }
  0x62   :  { %1707 = vmatpush1.bf16.msra.mxu0 %v3109_v23  ;;  %1667 = vmatprep.subr.bf16.mxu1 %v3110_v24  ;;  %v3142_v45 = vld [vmem:[#allocation5 + $0x364] ss:$16 sps:$4 sm:$0xff]   ;;  %v3145_v50 = vld [vmem:[#allocation5 + $0x360] ss:$16 sps:$4 sm:$0xff]   ;;  %v3191_v23 = vld [vmem:[#allocation5 + $0x68] ss:$16 sps:$4 sm:$0xff]  }
  0x63   :  { %1708 = vmatprep.subr.bf16.mxu0 %v3112_v25  ;;  %v3146_v51 = vld [vmem:[#allocation5 + $0x184] ss:$16 sps:$4 sm:$0xff]   ;;  %v3150_v54 = vld [vmem:[#allocation5 + $0x180] ss:$16 sps:$4 sm:$0xff]   ;;  %v3199_v25 = vld [vmem:[#allocation5 + $0x8c] ss:$16 sps:$4 sm:$0xff]  }
  0x64   :  { %v3148_v53 = vld [vmem:[#allocation5 + $0x384] ss:$16 sps:$4 sm:$0xff]   ;;  %v3151_v55 = vld [vmem:[#allocation5 + $0x380] ss:$16 sps:$4 sm:$0xff]  }
  0x65   :  { %1668 = vmatpush1.bf16.msra.mxu1 %v3114_v26  ;;  %v3152_v56 = vld [vmem:[#allocation5 + $0x1a4] ss:$16 sps:$4 sm:$0xff]   ;;  %v3156_v58 = vld [vmem:[#allocation5 + $0x1a0] ss:$16 sps:$4 sm:$0xff]  }
  0x66   :  { %1709 = vmatpush1.bf16.msra.mxu0 %v3115_v27  ;;  %1669 = vmatprep.subr.bf16.mxu1 %v3116_v28  ;;  %v3154_v57 = vld [vmem:[#allocation5 + $0x3a4] ss:$16 sps:$4 sm:$0xff]   ;;  %v3157_v59 = vld [vmem:[#allocation5 + $0x3a0] ss:$16 sps:$4 sm:$0xff]   ;;  %v3197_v27 = vld [vmem:[#allocation5 + $0x88] ss:$16 sps:$4 sm:$0xff]  }
  0x67   :  { %1710 = vmatprep.subr.bf16.mxu0 %v3118_v29  ;;  %v3158_v60 = vld [vmem:[#allocation5 + $0x1c4] ss:$16 sps:$4 sm:$0xff]   ;;  %v3162_v62 = vld [vmem:[#allocation5 + $0x1c0] ss:$16 sps:$4 sm:$0xff]   ;;  %v3205_v29 = vld [vmem:[#allocation5 + $0xac] ss:$16 sps:$4 sm:$0xff]  }
  0x68   :  { %v3160_v61 = vld [vmem:[#allocation5 + $0x3c4] ss:$16 sps:$4 sm:$0xff]   ;;  %v3163_v63 = vld [vmem:[#allocation5 + $0x3c0] ss:$16 sps:$4 sm:$0xff]  }
  0x69   :  { %1670 = vmatpush1.bf16.msra.mxu1 %v3120_v30  ;;  %v3164_v0 = vld [vmem:[#allocation5 + $0x1e4] ss:$16 sps:$4 sm:$0xff]   ;;  %v3168_v2 = vld [vmem:[#allocation5 + $0x1e0] ss:$16 sps:$4 sm:$0xff]  }
  0x6a   :  { %1711 = vmatpush1.bf16.msra.mxu0 %v3121_v31  ;;  %1671 = vmatprep.subr.bf16.mxu1 %v3122_v32  ;;  %v3166_v1 = vld [vmem:[#allocation5 + $0x3e4] ss:$16 sps:$4 sm:$0xff]   ;;  %v3169_v3 = vld [vmem:[#allocation5 + $0x3e0] ss:$16 sps:$4 sm:$0xff]   ;;  %v3203_v31 = vld [vmem:[#allocation5 + $0xa8] ss:$16 sps:$4 sm:$0xff]  }
  0x6b   :  { %1712 = vmatprep.subr.bf16.mxu0 %v3124_v33  ;;  %v81_v4 = vld [vmem:[#allocation2] sm:$0xff]  ;;  %v83_v6 = vld [vmem:[#allocation2 + $0x10] sm:$0xff]  ;;  %v3211_v33 = vld [vmem:[#allocation5 + $0xcc] ss:$16 sps:$4 sm:$0xff]  }
  0x6c   :  { %v3172_v5 = vld [vmem:[#allocation5 + $0x404] ss:$16 sps:$4 sm:$0xff]   ;;  %v3793_v8 = vpack.c.bf16 %v81_v4, %v81_v4  ;;  %v3170_v9 = vld [vmem:[#allocation5 + $0x400] ss:$16 sps:$4 sm:$0xff]   ;;  %v3795_v11 = vpack.c.bf16 %v83_v6, %v83_v6  ;;  %v3259_v4 = vld [vmem:[#allocation5 + $0x1cc] ss:$16 sps:$4 sm:$0xff]  }
  0x6d   :  { %1672 = vmatpush1.bf16.msra.mxu1 %v3126_v34  ;;  %v3178_v12 = vld [vmem:[#allocation5 + $0x424] ss:$16 sps:$4 sm:$0xff]   ;;  %v3176_v14 = vld [vmem:[#allocation5 + $0x420] ss:$16 sps:$4 sm:$0xff]   ;;  %v86_v34 = vld [vmem:[#allocation2 + $0x28] sm:$0xff] }
  0x6e   :  { %1713 = vmatpush1.bf16.msra.mxu0 %v3127_v35  ;;  %1673 = vmatprep.subr.bf16.mxu1 %v3128_v36  ;;  %v3184_v16 = vld [vmem:[#allocation5 + $0x444] ss:$16 sps:$4 sm:$0xff]   ;;  %v3182_v18 = vld [vmem:[#allocation5 + $0x440] ss:$16 sps:$4 sm:$0xff]   ;;  %v3800_v36 = vpack.c.bf16 %v86_v34, %v86_v34  ;;  %v3257_v6 = vld [vmem:[#allocation5 + $0x1c8] ss:$16 sps:$4 sm:$0xff]  }
  0x6f   :  { %1714 = vmatprep.subr.bf16.mxu0 %v3130_v37  ;;  %v3190_v20 = vld [vmem:[#allocation5 + $0x464] ss:$16 sps:$4 sm:$0xff]   ;;  %v3188_v22 = vld [vmem:[#allocation5 + $0x460] ss:$16 sps:$4 sm:$0xff]   ;;  %v3209_v37 = vld [vmem:[#allocation5 + $0xc8] ss:$16 sps:$4 sm:$0xff]  }
  0x70   :  { %v3196_v24 = vld [vmem:[#allocation5 + $0x484] ss:$16 sps:$4 sm:$0xff]   ;;  %v3194_v26 = vld [vmem:[#allocation5 + $0x480] ss:$16 sps:$4 sm:$0xff]  }
  0x71   :  { %1674 = vmatpush1.bf16.msra.mxu1 %v3132_v38  ;;  %v3202_v28 = vld [vmem:[#allocation5 + $0x4a4] ss:$16 sps:$4 sm:$0xff]   ;;  %v3200_v30 = vld [vmem:[#allocation5 + $0x4a0] ss:$16 sps:$4 sm:$0xff]  }
  0x72   :  { %1715 = vmatpush1.bf16.msra.mxu0 %v3133_v39  ;;  %1675 = vmatprep.subr.bf16.mxu1 %v3134_v40  ;;  %v3208_v32 = vld [vmem:[#allocation5 + $0x4c4] ss:$16 sps:$4 sm:$0xff]   ;;  %v3206_v35 = vld [vmem:[#allocation5 + $0x4c0] ss:$16 sps:$4 sm:$0xff]   ;;  %v3217_v39 = vld [vmem:[#allocation5 + $0xec] ss:$16 sps:$4 sm:$0xff]  }
  0x73   :  { %1716 = vmatprep.subr.bf16.mxu0 %v3136_v41  ;;  %v3214_v38 = vld [vmem:[#allocation5 + $0x4e4] ss:$16 sps:$4 sm:$0xff]   ;;  %v3212_v40 = vld [vmem:[#allocation5 + $0x4e0] ss:$16 sps:$4 sm:$0xff]   ;;  %v3215_v41 = vld [vmem:[#allocation5 + $0xe8] ss:$16 sps:$4 sm:$0xff]  }
  0x74   :  { %v3226_v46 = vld [vmem:[#allocation5 + $0x524] ss:$16 sps:$4 sm:$0xff]   ;;  %v3290_v34 = vld [vmem:[#allocation5 + $0x680] ss:$16 sps:$4 sm:$0xff]  }
  0x75   :  { %1676 = vmatpush1.bf16.msra.mxu1 %v3138_v42  ;;  %v3220_v42 = vld [vmem:[#allocation5 + $0x504] ss:$16 sps:$4 sm:$0xff]  }
  0x76   :  { %1717 = vmatpush1.bf16.msra.mxu0 %v3139_v43  ;;  %1677 = vmatprep.subr.bf16.mxu1 %v3140_v44  ;;  %v3223_v43 = vld [vmem:[#allocation5 + $0x10c] ss:$16 sps:$4 sm:$0xff]   ;;  %v3218_v44 = vld [vmem:[#allocation5 + $0x500] ss:$16 sps:$4 sm:$0xff]  }
  0x77   :  { %1718 = vmatprep.subr.bf16.mxu0 %v3142_v45  ;;  %v3221_v45 = vld [vmem:[#allocation5 + $0x108] ss:$16 sps:$4 sm:$0xff]  }
  0x79   :  { %1678 = vmatpush1.bf16.msra.mxu1 %v3144_v47  ;;  %v3229_v47 = vld [vmem:[#allocation5 + $0x12c] ss:$16 sps:$4 sm:$0xff]  }
  0x7a   :  { %1719 = vmatpush1.bf16.msra.mxu0 %v3145_v50  ;;  %1679 = vmatprep.subr.bf16.mxu1 %v3146_v51  ;;  %v3232_v50 = vld [vmem:[#allocation5 + $0x544] ss:$16 sps:$4 sm:$0xff]   ;;  %v3235_v51 = vld [vmem:[#allocation5 + $0x14c] ss:$16 sps:$4 sm:$0xff]  }
  0x7b   :  { %1720 = vmatprep.subr.bf16.mxu0 %v3148_v53  ;;  %v3230_v53 = vld [vmem:[#allocation5 + $0x540] ss:$16 sps:$4 sm:$0xff]  }
  0x7d   :  { %1680 = vmatpush1.bf16.msra.mxu1 %v3150_v54  ;;  %v3233_v54 = vld [vmem:[#allocation5 + $0x148] ss:$16 sps:$4 sm:$0xff]  }
  0x7e   :  { %1721 = vmatpush1.bf16.msra.mxu0 %v3151_v55  ;;  %1681 = vmatprep.subr.bf16.mxu1 %v3152_v56  ;;  %v3238_v55 = vld [vmem:[#allocation5 + $0x564] ss:$16 sps:$4 sm:$0xff]   ;;  %v3241_v56 = vld [vmem:[#allocation5 + $0x16c] ss:$16 sps:$4 sm:$0xff]  }
  0x7f   :  { %1722 = vmatprep.subr.bf16.mxu0 %v3154_v57  ;;  %v3236_v57 = vld [vmem:[#allocation5 + $0x560] ss:$16 sps:$4 sm:$0xff]  }
  0x81   :  { %1682 = vmatpush1.bf16.msra.mxu1 %v3156_v58  ;;  %v3239_v58 = vld [vmem:[#allocation5 + $0x168] ss:$16 sps:$4 sm:$0xff]  }
  0x82   :  { %1723 = vmatpush1.bf16.msra.mxu0 %v3157_v59  ;;  %1683 = vmatprep.subr.bf16.mxu1 %v3158_v60  ;;  %v3244_v59 = vld [vmem:[#allocation5 + $0x584] ss:$16 sps:$4 sm:$0xff]   ;;  %v3247_v60 = vld [vmem:[#allocation5 + $0x18c] ss:$16 sps:$4 sm:$0xff]  }
  0x83   :  { %1724 = vmatprep.subr.bf16.mxu0 %v3160_v61  ;;  %v3242_v61 = vld [vmem:[#allocation5 + $0x580] ss:$16 sps:$4 sm:$0xff]  }
  0x85   :  { %1684 = vmatpush1.bf16.msra.mxu1 %v3162_v62  ;;  %v3245_v62 = vld [vmem:[#allocation5 + $0x188] ss:$16 sps:$4 sm:$0xff]  }
  0x86   :  { %1725 = vmatpush1.bf16.msra.mxu0 %v3163_v63  ;;  %1685 = vmatprep.subr.bf16.mxu1 %v3164_v0  ;;  %v3250_v63 = vld [vmem:[#allocation5 + $0x5a4] ss:$16 sps:$4 sm:$0xff]   ;;  %v3253_v0 = vld [vmem:[#allocation5 + $0x1ac] ss:$16 sps:$4 sm:$0xff]  }
  0x87   :  { %1726 = vmatprep.subr.bf16.mxu0 %v3166_v1  ;;  %v3248_v1 = vld [vmem:[#allocation5 + $0x5a0] ss:$16 sps:$4 sm:$0xff]  }
  0x89   :  { %1686 = vmatpush1.bf16.msra.mxu1 %v3168_v2  ;;  %v3251_v2 = vld [vmem:[#allocation5 + $0x1a8] ss:$16 sps:$4 sm:$0xff]  }
  0x8a   :  { %1727 = vmatpush1.bf16.msra.mxu0 %v3169_v3  ;;  %1819 = vmatprep.subr.bf16.mxu1 %v3175_v7  ;;  %v3256_v3 = vld [vmem:[#allocation5 + $0x5c4] ss:$16 sps:$4 sm:$0xff]  }
  0x8b   :  { %1737 = vmatprep.subr.bf16.mxu0 %v3172_v5  ;;  %v3254_v5 = vld [vmem:[#allocation5 + $0x5c0] ss:$16 sps:$4 sm:$0xff]   ;;  %v3262_v7 = vld [vmem:[#allocation5 + $0x5e4] ss:$16 sps:$4 sm:$0xff]  }
  0x8c   :  { %1688 = vmatmul.mubr.bf16.vlgmr.msra.gmra.mrb[0].mxu1 %v3793_v8 }
  0x8d   :  { %1729 = vmatmul.mubr.bf16.vlgmr.msra.gmra.mrb[0].mxu0 %v3795_v11  ;;  %1820 = vmatpush1.bf16.msra.mxu1 %v3173_v10  ;;  %v3260_v10 = vld [vmem:[#allocation5 + $0x5e0] ss:$16 sps:$4 sm:$0xff]  }
  0x8e   :  { %1738 = vmatpush1.bf16.msra.mxu0 %v3170_v9  ;;  %1821 = vmatprep.subr.bf16.mxu1 %v3181_v13  ;;  %v3265_v9 = vld [vmem:[#allocation5 + $0x1ec] ss:$16 sps:$4 sm:$0xff]   ;;  %v85_v13 = vld [vmem:[#allocation2 + $0x20] sm:$0xff] }
  0x8f   :  { %1739 = vmatprep.subr.bf16.mxu0 %v3178_v12  ;;  %1851 = vmatprep.mubr.bf16.mxu1 %v3787_v48  ;;  %v3224_v48 = vld [vmem:[#allocation5 + $0x520] ss:$16 sps:$4 sm:$0xff]   ;;  %v3263_v12 = vld [vmem:[#allocation5 + $0x1e8] ss:$16 sps:$4 sm:$0xff]  }
  0x90   :  { %1769 = vmatprep.mubr.bf16.mxu0 %v3800_v36 }
  0x91   :  { %1822 = vmatpush1.bf16.msra.mxu1 %v3179_v15  ;;  %v3271_v15 = vld [vmem:[#allocation5 + $0x20c] ss:$16 sps:$4 sm:$0xff]  }
  0x92   :  { %1740 = vmatpush1.bf16.msra.mxu0 %v3176_v14  ;;  %1823 = vmatprep.subr.bf16.mxu1 %v3187_v17  ;;  %v3268_v14 = vld [vmem:[#allocation5 + $0x604] ss:$16 sps:$4 sm:$0xff]   ;;  %v3266_v17 = vld [vmem:[#allocation5 + $0x600] ss:$16 sps:$4 sm:$0xff]  }
  0x93   :  { %1741 = vmatprep.subr.bf16.mxu0 %v3184_v16  ;;  %v3803_v16 = vpack.c.bf16 %v85_v13, %v85_v13  ;;  %v3350_v13 = vld [vmem:[#allocation5 + $0x7c0] ss:$16 sps:$4 sm:$0xff]  }
  0x95   :  { %1824 = vmatpush1.bf16.msra.mxu1 %v3185_v19  ;;  %v3274_v19 = vld [vmem:[#allocation5 + $0x624] ss:$16 sps:$4 sm:$0xff]  }
  0x96   :  { %1742 = vmatpush1.bf16.msra.mxu0 %v3182_v18  ;;  %1825 = vmatprep.subr.bf16.mxu1 %v3193_v21  ;;  %v3269_v18 = vld [vmem:[#allocation5 + $0x208] ss:$16 sps:$4 sm:$0xff]  }
  0x97   :  { %1743 = vmatprep.subr.bf16.mxu0 %v3190_v20  ;;  %v3277_v20 = vld [vmem:[#allocation5 + $0x22c] ss:$16 sps:$4 sm:$0xff]  }
  0x98   :  { %v88_v21 = vld [vmem:[#allocation2 + $0x38] sm:$0xff] }
  0x99   :  { %1826 = vmatpush1.bf16.msra.mxu1 %v3191_v23  ;;  %v3275_v23 = vld [vmem:[#allocation5 + $0x228] ss:$16 sps:$4 sm:$0xff]  }
  0x9a   :  { %1744 = vmatpush1.bf16.msra.mxu0 %v3188_v22  ;;  %1827 = vmatprep.subr.bf16.mxu1 %v3199_v25  ;;  %v3272_v22 = vld [vmem:[#allocation5 + $0x620] ss:$16 sps:$4 sm:$0xff]   ;;  %v3280_v25 = vld [vmem:[#allocation5 + $0x644] ss:$16 sps:$4 sm:$0xff]  }
  0x9b   :  { %1745 = vmatprep.subr.bf16.mxu0 %v3196_v24  ;;  %v3807_v24 = vpack.c.bf16 %v88_v21, %v88_v21  ;;  %v3364_v21 = vld [vmem:[#allocation5 + $0x40c] ss:$16 sps:$4 sm:$0xff]  }
  0x9d   :  { %1828 = vmatpush1.bf16.msra.mxu1 %v3197_v27  ;;  %v3278_v27 = vld [vmem:[#allocation5 + $0x640] ss:$16 sps:$4 sm:$0xff]  }
  0x9e   :  { %1746 = vmatpush1.bf16.msra.mxu0 %v3194_v26  ;;  %1829 = vmatprep.subr.bf16.mxu1 %v3205_v29  ;;  %v3283_v26 = vld [vmem:[#allocation5 + $0x24c] ss:$16 sps:$4 sm:$0xff]   ;;  %v3286_v29 = vld [vmem:[#allocation5 + $0x664] ss:$16 sps:$4 sm:$0xff]  }
  0x9f   :  { %1747 = vmatprep.subr.bf16.mxu0 %v3202_v28  ;;  %v3281_v28 = vld [vmem:[#allocation5 + $0x248] ss:$16 sps:$4 sm:$0xff]  }
  0xa1   :  { %1830 = vmatpush1.bf16.msra.mxu1 %v3203_v31  ;;  %v3287_v31 = vld [vmem:[#allocation5 + $0x268] ss:$16 sps:$4 sm:$0xff]  }
  0xa2   :  { %1748 = vmatpush1.bf16.msra.mxu0 %v3200_v30  ;;  %1831 = vmatprep.subr.bf16.mxu1 %v3211_v33  ;;  %v3284_v30 = vld [vmem:[#allocation5 + $0x660] ss:$16 sps:$4 sm:$0xff]   ;;  %v3295_v33 = vld [vmem:[#allocation5 + $0x28c] ss:$16 sps:$4 sm:$0xff]  }
  0xa3   :  { %1749 = vmatprep.subr.bf16.mxu0 %v3208_v32  ;;  %v3292_v32 = vld [vmem:[#allocation5 + $0x684] ss:$16 sps:$4 sm:$0xff]  }
  0xa5   :  { %1832 = vmatpush1.bf16.msra.mxu1 %v3209_v37  ;;  %v3301_v37 = vld [vmem:[#allocation5 + $0x2ac] ss:$16 sps:$4 sm:$0xff]  }
  0xa6   :  { %1750 = vmatpush1.bf16.msra.mxu0 %v3206_v35  ;;  %1833 = vmatprep.subr.bf16.mxu1 %v3217_v39  ;;  %v3293_v35 = vld [vmem:[#allocation5 + $0x288] ss:$16 sps:$4 sm:$0xff]  }
  0xa7   :  { %1751 = vmatprep.subr.bf16.mxu0 %v3214_v38  ;;  %v3296_v38 = vld [vmem:[#allocation5 + $0x6a0] ss:$16 sps:$4 sm:$0xff]   ;;  %v3299_v39 = vld [vmem:[#allocation5 + $0x2a8] ss:$16 sps:$4 sm:$0xff]  }
  0xa9   :  { %1834 = vmatpush1.bf16.msra.mxu1 %v3215_v41  ;;  %v3307_v41 = vld [vmem:[#allocation5 + $0x2cc] ss:$16 sps:$4 sm:$0xff]  }
  0xaa   :  { %1752 = vmatpush1.bf16.msra.mxu0 %v3212_v40  ;;  %1835 = vmatprep.subr.bf16.mxu1 %v3223_v43  ;;  %v3304_v40 = vld [vmem:[#allocation5 + $0x6c4] ss:$16 sps:$4 sm:$0xff]   ;;  %v3305_v43 = vld [vmem:[#allocation5 + $0x2c8] ss:$16 sps:$4 sm:$0xff]  }
  0xab   :  { %1753 = vmatprep.subr.bf16.mxu0 %v3220_v42  ;;  %v3302_v42 = vld [vmem:[#allocation5 + $0x6c0] ss:$16 sps:$4 sm:$0xff]  }
  0xad   :  { %1836 = vmatpush1.bf16.msra.mxu1 %v3221_v45  ;;  %v3313_v45 = vld [vmem:[#allocation5 + $0x2ec] ss:$16 sps:$4 sm:$0xff]  }
  0xae   :  { %1754 = vmatpush1.bf16.msra.mxu0 %v3218_v44  ;;  %1837 = vmatprep.subr.bf16.mxu1 %v3229_v47  ;;  %v3310_v44 = vld [vmem:[#allocation5 + $0x6e4] ss:$16 sps:$4 sm:$0xff]   ;;  %v3311_v47 = vld [vmem:[#allocation5 + $0x2e8] ss:$16 sps:$4 sm:$0xff]  }
  0xaf   :  { %1755 = vmatprep.subr.bf16.mxu0 %v3226_v46  ;;  %v3308_v46 = vld [vmem:[#allocation5 + $0x6e0] ss:$16 sps:$4 sm:$0xff]  }
  0xb1   :  { %1838 = vmatpush1.bf16.msra.mxu1 %v3227_v49  ;;  %v3319_v49 = vld [vmem:[#allocation5 + $0x30c] ss:$16 sps:$4 sm:$0xff]  }
  0xb2   :  { %1756 = vmatpush1.bf16.msra.mxu0 %v3224_v48  ;;  %1839 = vmatprep.subr.bf16.mxu1 %v3235_v51  ;;  %v3316_v48 = vld [vmem:[#allocation5 + $0x704] ss:$16 sps:$4 sm:$0xff]   ;;  %v3317_v51 = vld [vmem:[#allocation5 + $0x308] ss:$16 sps:$4 sm:$0xff]  }
  0xb3   :  { %1757 = vmatprep.subr.bf16.mxu0 %v3232_v50  ;;  %v3314_v50 = vld [vmem:[#allocation5 + $0x700] ss:$16 sps:$4 sm:$0xff]  }
  0xb5   :  { %1840 = vmatpush1.bf16.msra.mxu1 %v3233_v54  ;;  %v3325_v54 = vld [vmem:[#allocation5 + $0x32c] ss:$16 sps:$4 sm:$0xff]  }
  0xb6   :  { %1758 = vmatpush1.bf16.msra.mxu0 %v3230_v53  ;;  %1841 = vmatprep.subr.bf16.mxu1 %v3241_v56  ;;  %v3322_v53 = vld [vmem:[#allocation5 + $0x724] ss:$16 sps:$4 sm:$0xff]   ;;  %v3323_v56 = vld [vmem:[#allocation5 + $0x328] ss:$16 sps:$4 sm:$0xff]  }
  0xb7   :  { %1759 = vmatprep.subr.bf16.mxu0 %v3238_v55  ;;  %v3320_v55 = vld [vmem:[#allocation5 + $0x720] ss:$16 sps:$4 sm:$0xff]  }
  0xb9   :  { %1842 = vmatpush1.bf16.msra.mxu1 %v3239_v58  ;;  %v3331_v58 = vld [vmem:[#allocation5 + $0x34c] ss:$16 sps:$4 sm:$0xff]  }
  0xba   :  { %1760 = vmatpush1.bf16.msra.mxu0 %v3236_v57  ;;  %1843 = vmatprep.subr.bf16.mxu1 %v3247_v60  ;;  %v3328_v57 = vld [vmem:[#allocation5 + $0x744] ss:$16 sps:$4 sm:$0xff]   ;;  %v3329_v60 = vld [vmem:[#allocation5 + $0x348] ss:$16 sps:$4 sm:$0xff]  }
  0xbb   :  { %1761 = vmatprep.subr.bf16.mxu0 %v3244_v59  ;;  %v3326_v59 = vld [vmem:[#allocation5 + $0x740] ss:$16 sps:$4 sm:$0xff]  }
  0xbd   :  { %1844 = vmatpush1.bf16.msra.mxu1 %v3245_v62  ;;  %v3337_v62 = vld [vmem:[#allocation5 + $0x36c] ss:$16 sps:$4 sm:$0xff]  }
  0xbe   :  { %1762 = vmatpush1.bf16.msra.mxu0 %v3242_v61  ;;  %1845 = vmatprep.subr.bf16.mxu1 %v3253_v0  ;;  %v3334_v61 = vld [vmem:[#allocation5 + $0x764] ss:$16 sps:$4 sm:$0xff]   ;;  %v3335_v0 = vld [vmem:[#allocation5 + $0x368] ss:$16 sps:$4 sm:$0xff]  }
  0xbf   :  { %1763 = vmatprep.subr.bf16.mxu0 %v3250_v63  ;;  %v3332_v63 = vld [vmem:[#allocation5 + $0x760] ss:$16 sps:$4 sm:$0xff]  }
  0xc1   :  { %1846 = vmatpush1.bf16.msra.mxu1 %v3251_v2  ;;  %v3343_v2 = vld [vmem:[#allocation5 + $0x38c] ss:$16 sps:$4 sm:$0xff]  }
  0xc2   :  { %1764 = vmatpush1.bf16.msra.mxu0 %v3248_v1  ;;  %1847 = vmatprep.subr.bf16.mxu1 %v3259_v4  ;;  %v3340_v1 = vld [vmem:[#allocation5 + $0x784] ss:$16 sps:$4 sm:$0xff]   ;;  %v3341_v4 = vld [vmem:[#allocation5 + $0x388] ss:$16 sps:$4 sm:$0xff]  }
  0xc3   :  { %1765 = vmatprep.subr.bf16.mxu0 %v3256_v3  ;;  %v3338_v3 = vld [vmem:[#allocation5 + $0x780] ss:$16 sps:$4 sm:$0xff]  }
  0xc5   :  { %1848 = vmatpush1.bf16.msra.mxu1 %v3257_v6  ;;  %v3349_v6 = vld [vmem:[#allocation5 + $0x3ac] ss:$16 sps:$4 sm:$0xff]  }
  0xc6   :  { %1766 = vmatpush1.bf16.msra.mxu0 %v3254_v5  ;;  %1849 = vmatprep.subr.bf16.mxu1 %v3265_v9  ;;  %v3346_v5 = vld [vmem:[#allocation5 + $0x7a4] ss:$16 sps:$4 sm:$0xff]   ;;  %v3347_v9 = vld [vmem:[#allocation5 + $0x3a8] ss:$16 sps:$4 sm:$0xff]  }
  0xc7   :  { %1767 = vmatprep.subr.bf16.mxu0 %v3262_v7  ;;  %v3344_v7 = vld [vmem:[#allocation5 + $0x7a0] ss:$16 sps:$4 sm:$0xff]  }
  0xc9   :  { %1850 = vmatpush1.bf16.msra.mxu1 %v3263_v12  ;;  %v3355_v12 = vld [vmem:[#allocation5 + $0x3cc] ss:$16 sps:$4 sm:$0xff]  }
  0xca   :  { %1768 = vmatpush1.bf16.msra.mxu0 %v3260_v10  ;;  %1860 = vmatprep.subr.bf16.mxu1 %v3271_v15  ;;  %v3352_v10 = vld [vmem:[#allocation5 + $0x7c4] ss:$16 sps:$4 sm:$0xff]  }
  0xcb   :  { %1778 = vmatprep.subr.bf16.mxu0 %v3268_v14  ;;  %v3353_v14 = vld [vmem:[#allocation5 + $0x3c8] ss:$16 sps:$4 sm:$0xff]   ;;  %v3358_v15 = vld [vmem:[#allocation5 + $0x7e4] ss:$16 sps:$4 sm:$0xff]  }
  0xcc   :  { %1852 = vmatmul.mubr.bf16.vlgmr.msra.gmra.mrb[4].mxu1 %v3793_v8  ;;  %v3289_v8 = vld [vmem:[#allocation5 + $0x26c] ss:$16 sps:$4 sm:$0xff]  }
  0xcd   :  { %1770 = vmatmul.mubr.bf16.vlgmr.msra.gmra.mrb[0].mxu0 %v3803_v16  ;;  %1861 = vmatpush1.bf16.msra.mxu1 %v3269_v18  ;;  %v3356_v18 = vld [vmem:[#allocation5 + $0x7e0] ss:$16 sps:$4 sm:$0xff]  }
  0xce   :  { %1779 = vmatpush1.bf16.msra.mxu0 %v3266_v17  ;;  %1862 = vmatprep.subr.bf16.mxu1 %v3277_v20  ;;  %v3361_v17 = vld [vmem:[#allocation5 + $0x3ec] ss:$16 sps:$4 sm:$0xff]   ;;  %v87_v20 = vld [vmem:[#allocation2 + $0x30] sm:$0xff] }
  0xcf   :  { %1780 = vmatprep.subr.bf16.mxu0 %v3274_v19  ;;  %1810 = vmatprep.mubr.bf16.mxu0 %v3807_v24  ;;  %v3359_v19 = vld [vmem:[#allocation5 + $0x3e8] ss:$16 sps:$4 sm:$0xff]  }
  0xd0   :  { %1892 = vmatprep.mubr.bf16.mxu1 %v3789_v52  ;;  %v3298_v52 = vld [vmem:[#allocation5 + $0x6a4] ss:$16 sps:$4 sm:$0xff]  }
  0xd1   :  { %1863 = vmatpush1.bf16.msra.mxu1 %v3275_v23  ;;  %v3811_v23 = vpack.c.bf16 %v87_v20, %v87_v20  ;;  %v3412_v20 = vld [vmem:[#allocation5 + $0x60c] ss:$16 sps:$4 sm:$0xff]  }
  0xd2   :  { %1781 = vmatpush1.bf16.msra.mxu0 %v3272_v22  ;;  %1864 = vmatprep.subr.bf16.mxu1 %v3283_v26  ;;  %v3362_v22 = vld [vmem:[#allocation5 + $0x408] ss:$16 sps:$4 sm:$0xff]  }
  0xd3   :  { %1782 = vmatprep.subr.bf16.mxu0 %v3280_v25  ;;  %v3367_v25 = vld [vmem:[#allocation5 + $0x42c] ss:$16 sps:$4 sm:$0xff]   ;;  %v3458_v26 = vld [vmem:[#allocation7] ss:$8 sps:$4 sm:$0xff]  }
  0xd5   :  { %1865 = vmatpush1.bf16.msra.mxu1 %v3281_v28  ;;  %v3365_v28 = vld [vmem:[#allocation5 + $0x428] ss:$16 sps:$4 sm:$0xff]  }
  0xd6   :  { %1783 = vmatpush1.bf16.msra.mxu0 %v3278_v27  ;;  %1866 = vmatprep.subr.bf16.mxu1 %v3289_v8  ;;  %v3460_v27 = vld [vmem:[#allocation7 + $0x4] ss:$8 sps:$4 sm:$0xff]  }
  0xd7   :  { %1784 = vmatprep.subr.bf16.mxu0 %v3286_v29  ;;  %v3463_v29 = vld [vmem:[#allocation7 + $0x14] ss:$8 sps:$4 sm:$0xff]  }
  0xd8   :  { %v3370_v8 = vld [vmem:[#allocation5 + $0x44c] ss:$16 sps:$4 sm:$0xff]  }
  0xd9   :  { %1867 = vmatpush1.bf16.msra.mxu1 %v3287_v31  ;;  %v3466_v31 = vld [vmem:[#allocation7 + $0x24] ss:$8 sps:$4 sm:$0xff]  }
  0xda   :  { %1785 = vmatpush1.bf16.msra.mxu0 %v3284_v30  ;;  %1868 = vmatprep.subr.bf16.mxu1 %v3295_v33  ;;  %v3461_v30 = vld [vmem:[#allocation7 + $0x10] ss:$8 sps:$4 sm:$0xff]   ;;  %v3373_v33 = vld [vmem:[#allocation5 + $0x46c] ss:$16 sps:$4 sm:$0xff]  }
  0xdb   :  { %1786 = vmatprep.subr.bf16.mxu0 %v3292_v32  ;;  %v3368_v32 = vld [vmem:[#allocation5 + $0x448] ss:$16 sps:$4 sm:$0xff]  }
  0xdd   :  { %1869 = vmatpush1.bf16.msra.mxu1 %v3293_v35  ;;  %v3376_v35 = vld [vmem:[#allocation5 + $0x48c] ss:$16 sps:$4 sm:$0xff]  }
  0xde   :  { %1787 = vmatpush1.bf16.msra.mxu0 %v3290_v34  ;;  %1870 = vmatprep.subr.bf16.mxu1 %v3301_v37  ;;  %v3371_v34 = vld [vmem:[#allocation5 + $0x468] ss:$16 sps:$4 sm:$0xff]   ;;  %v3472_v37 = vld [vmem:[#allocation7 + $0x44] ss:$8 sps:$4 sm:$0xff]  }
  0xdf   :  { %1788 = vmatprep.subr.bf16.mxu0 %v3298_v52  ;;  %v3469_v52 = vld [vmem:[#allocation7 + $0x34] ss:$8 sps:$4 sm:$0xff]  }
  0xe1   :  { %1871 = vmatpush1.bf16.msra.mxu1 %v3299_v39  ;;  %v3379_v39 = vld [vmem:[#allocation5 + $0x4ac] ss:$16 sps:$4 sm:$0xff]  }
  0xe2   :  { %1789 = vmatpush1.bf16.msra.mxu0 %v3296_v38  ;;  %1872 = vmatprep.subr.bf16.mxu1 %v3307_v41  ;;  %v3374_v38 = vld [vmem:[#allocation5 + $0x488] ss:$16 sps:$4 sm:$0xff]   ;;  %v3475_v41 = vld [vmem:[#allocation7 + $0x54] ss:$8 sps:$4 sm:$0xff]  }
  0xe3   :  { %1790 = vmatprep.subr.bf16.mxu0 %v3304_v40  ;;  %v3470_v40 = vld [vmem:[#allocation7 + $0x40] ss:$8 sps:$4 sm:$0xff]  }
  0xe5   :  { %1873 = vmatpush1.bf16.msra.mxu1 %v3305_v43  ;;  %v3382_v43 = vld [vmem:[#allocation5 + $0x4cc] ss:$16 sps:$4 sm:$0xff]  }
  0xe6   :  { %1791 = vmatpush1.bf16.msra.mxu0 %v3302_v42  ;;  %1874 = vmatprep.subr.bf16.mxu1 %v3313_v45  ;;  %v3377_v42 = vld [vmem:[#allocation5 + $0x4a8] ss:$16 sps:$4 sm:$0xff]   ;;  %v3478_v45 = vld [vmem:[#allocation7 + $0x64] ss:$8 sps:$4 sm:$0xff]  }
  0xe7   :  { %1792 = vmatprep.subr.bf16.mxu0 %v3310_v44  ;;  %v3473_v44 = vld [vmem:[#allocation7 + $0x50] ss:$8 sps:$4 sm:$0xff]  }
  0xe9   :  { %1875 = vmatpush1.bf16.msra.mxu1 %v3311_v47  ;;  %v3385_v47 = vld [vmem:[#allocation5 + $0x4ec] ss:$16 sps:$4 sm:$0xff]  }
  0xea   :  { %1793 = vmatpush1.bf16.msra.mxu0 %v3308_v46  ;;  %1876 = vmatprep.subr.bf16.mxu1 %v3319_v49  ;;  %v3380_v46 = vld [vmem:[#allocation5 + $0x4c8] ss:$16 sps:$4 sm:$0xff]   ;;  %v3481_v49 = vld [vmem:[#allocation7 + $0x74] ss:$8 sps:$4 sm:$0xff]  }
  0xeb   :  { %1794 = vmatprep.subr.bf16.mxu0 %v3316_v48  ;;  %v3476_v48 = vld [vmem:[#allocation7 + $0x60] ss:$8 sps:$4 sm:$0xff]  }
  0xed   :  { %1877 = vmatpush1.bf16.msra.mxu1 %v3317_v51  ;;  %v3388_v51 = vld [vmem:[#allocation5 + $0x50c] ss:$16 sps:$4 sm:$0xff]  }
  0xee   :  { %1795 = vmatpush1.bf16.msra.mxu0 %v3314_v50  ;;  %1878 = vmatprep.subr.bf16.mxu1 %v3325_v54  ;;  %v3383_v50 = vld [vmem:[#allocation5 + $0x4e8] ss:$16 sps:$4 sm:$0xff]   ;;  %v3484_v54 = vld [vmem:[#allocation7 + $0x84] ss:$8 sps:$4 sm:$0xff]  }
  0xef   :  { %1796 = vmatprep.subr.bf16.mxu0 %v3322_v53  ;;  %v3479_v53 = vld [vmem:[#allocation7 + $0x70] ss:$8 sps:$4 sm:$0xff]  }
  0xf1   :  { %1879 = vmatpush1.bf16.msra.mxu1 %v3323_v56  ;;  %v3391_v56 = vld [vmem:[#allocation5 + $0x52c] ss:$16 sps:$4 sm:$0xff]  }
  0xf2   :  { %1797 = vmatpush1.bf16.msra.mxu0 %v3320_v55  ;;  %1880 = vmatprep.subr.bf16.mxu1 %v3331_v58  ;;  %v3386_v55 = vld [vmem:[#allocation5 + $0x508] ss:$16 sps:$4 sm:$0xff]   ;;  %v3487_v58 = vld [vmem:[#allocation7 + $0x94] ss:$8 sps:$4 sm:$0xff]  }
  0xf3   :  { %1798 = vmatprep.subr.bf16.mxu0 %v3328_v57  ;;  %v3482_v57 = vld [vmem:[#allocation7 + $0x80] ss:$8 sps:$4 sm:$0xff]  }
  0xf5   :  { %1881 = vmatpush1.bf16.msra.mxu1 %v3329_v60  ;;  %v3394_v60 = vld [vmem:[#allocation5 + $0x54c] ss:$16 sps:$4 sm:$0xff]  }
  0xf6   :  { %1799 = vmatpush1.bf16.msra.mxu0 %v3326_v59  ;;  %1882 = vmatprep.subr.bf16.mxu1 %v3337_v62  ;;  %v3389_v59 = vld [vmem:[#allocation5 + $0x528] ss:$16 sps:$4 sm:$0xff]   ;;  %v3490_v62 = vld [vmem:[#allocation7 + $0xa4] ss:$8 sps:$4 sm:$0xff]  }
  0xf7   :  { %1800 = vmatprep.subr.bf16.mxu0 %v3334_v61  ;;  %v3485_v61 = vld [vmem:[#allocation7 + $0x90] ss:$8 sps:$4 sm:$0xff]  }
  0xf9   :  { %1883 = vmatpush1.bf16.msra.mxu1 %v3335_v0  ;;  %v3397_v0 = vld [vmem:[#allocation5 + $0x56c] ss:$16 sps:$4 sm:$0xff]  }
  0xfa   :  { %1801 = vmatpush1.bf16.msra.mxu0 %v3332_v63  ;;  %1884 = vmatprep.subr.bf16.mxu1 %v3343_v2  ;;  %v3392_v63 = vld [vmem:[#allocation5 + $0x548] ss:$16 sps:$4 sm:$0xff]   ;;  %v3493_v2 = vld [vmem:[#allocation7 + $0xb4] ss:$8 sps:$4 sm:$0xff]  }
  0xfb   :  { %1802 = vmatprep.subr.bf16.mxu0 %v3340_v1  ;;  %v3488_v1 = vld [vmem:[#allocation7 + $0xa0] ss:$8 sps:$4 sm:$0xff]  }
  0xfd   :  { %1885 = vmatpush1.bf16.msra.mxu1 %v3341_v4  ;;  %v3400_v4 = vld [vmem:[#allocation5 + $0x58c] ss:$16 sps:$4 sm:$0xff]  }
  0xfe   :  { %1803 = vmatpush1.bf16.msra.mxu0 %v3338_v3  ;;  %1886 = vmatprep.subr.bf16.mxu1 %v3349_v6  ;;  %v3395_v3 = vld [vmem:[#allocation5 + $0x568] ss:$16 sps:$4 sm:$0xff]   ;;  %v3496_v6 = vld [vmem:[#allocation7 + $0xc4] ss:$8 sps:$4 sm:$0xff]  }
  0xff   :  { %1804 = vmatprep.subr.bf16.mxu0 %v3346_v5  ;;  %v3491_v5 = vld [vmem:[#allocation7 + $0xb0] ss:$8 sps:$4 sm:$0xff]  }
 0x101   :  { %1887 = vmatpush1.bf16.msra.mxu1 %v3347_v9  ;;  %v3403_v9 = vld [vmem:[#allocation5 + $0x5ac] ss:$16 sps:$4 sm:$0xff]  }
 0x102   :  { %1805 = vmatpush1.bf16.msra.mxu0 %v3344_v7  ;;  %1888 = vmatprep.subr.bf16.mxu1 %v3355_v12  ;;  %v3398_v7 = vld [vmem:[#allocation5 + $0x588] ss:$16 sps:$4 sm:$0xff]   ;;  %v3499_v12 = vld [vmem:[#allocation7 + $0xd4] ss:$8 sps:$4 sm:$0xff]  }
 0x103   :  { %1806 = vmatprep.subr.bf16.mxu0 %v3352_v10  ;;  %v3494_v10 = vld [vmem:[#allocation7 + $0xc0] ss:$8 sps:$4 sm:$0xff]  }
 0x105   :  { %1889 = vmatpush1.bf16.msra.mxu1 %v3353_v14  ;;  %v3406_v14 = vld [vmem:[#allocation5 + $0x5cc] ss:$16 sps:$4 sm:$0xff]  }
 0x106   :  { %1807 = vmatpush1.bf16.msra.mxu0 %v3350_v13  ;;  %1890 = vmatprep.subr.bf16.mxu1 %v3361_v17  ;;  %v3401_v13 = vld [vmem:[#allocation5 + $0x5a8] ss:$16 sps:$4 sm:$0xff]  }
 0x107   :  { %1808 = vmatprep.subr.bf16.mxu0 %v3358_v15  ;;  %v3497_v15 = vld [vmem:[#allocation7 + $0xd0] ss:$8 sps:$4 sm:$0xff]  }
 0x108   :  { %v3404_v17 = vld [vmem:[#allocation5 + $0x5c8] ss:$16 sps:$4 sm:$0xff]  }
 0x109   :  { %1891 = vmatpush1.bf16.msra.mxu1 %v3359_v19  ;;  %v3407_v19 = vld [vmem:[#allocation5 + $0x5e8] ss:$16 sps:$4 sm:$0xff]  }
 0x10a   :  { %1809 = vmatpush1.bf16.msra.mxu0 %v3356_v18  ;;  %1901 = vmatprep.subr.bf16.mxu1 %v3364_v21  ;;  %v3409_v18 = vld [vmem:[#allocation5 + $0x5ec] ss:$16 sps:$4 sm:$0xff]   ;;  %v3410_v21 = vld [vmem:[#allocation5 + $0x608] ss:$16 sps:$4 sm:$0xff]  }
 0x10b   :  { %2391 = vmatprep.subr.bf16.mxu0 %v3460_v27  ;;  %v3416_v27 = vld [vmem:[#allocation5 + $0x648] ss:$16 sps:$4 sm:$0xff]  }
 0x10c   :  { %1893 = vmatmul.mubr.bf16.vlgmr.msra.gmra.mrb[4].mxu1 %v3795_v11  ;;  %v3464_v11 = vld [vmem:[#allocation7 + $0x20] ss:$8 sps:$4 sm:$0xff]  }
 0x10d   :  { %1811 = vmatmul.mubr.bf16.vlgmr.msra.gmra.mrb[0].mxu0 %v3811_v23  ;;  %1902 = vmatpush1.bf16.msra.mxu1 %v3362_v22  ;;  %v3415_v22 = vld [vmem:[#allocation5 + $0x62c] ss:$16 sps:$4 sm:$0xff]  }
 0x10e   :  { %1933 = vmatprep.mubr.bf16.mxu1 %v3800_v36  ;;  %1903 = vmatprep.subr.bf16.mxu1 %v3367_v25  ;;  %v3467_v36 = vld [vmem:[#allocation7 + $0x30] ss:$8 sps:$4 sm:$0xff]  }
 0x10f   :  { %2392 = vmatpush1.bf16.msra.mxu0 %v3458_v26  ;;  %v3413_v25 = vld [vmem:[#allocation5 + $0x628] ss:$16 sps:$4 sm:$0xff]   ;;  %v3418_v26 = vld [vmem:[#allocation5 + $0x64c] ss:$16 sps:$4 sm:$0xff]  }
 0x110   :  { %2393 = vmatprep.subr.bf16.mxu0 %v3463_v29  ;;  %v3419_v29 = vld [vmem:[#allocation5 + $0x668] ss:$16 sps:$4 sm:$0xff]  }
 0x111   :  { %1904 = vmatpush1.bf16.msra.mxu1 %v3365_v28  ;;  %v3421_v28 = vld [vmem:[#allocation5 + $0x66c] ss:$16 sps:$4 sm:$0xff]  }
 0x112   :  { %1905 = vmatprep.subr.bf16.mxu1 %v3370_v8  ;;  %v3424_v8 = vld [vmem:[#allocation5 + $0x68c] ss:$16 sps:$4 sm:$0xff]  }
 0x113   :  { %2394 = vmatpush1.bf16.msra.mxu0 %v3461_v30  ;;  %v3422_v30 = vld [vmem:[#allocation5 + $0x688] ss:$16 sps:$4 sm:$0xff]  }
 0x114   :  { %2395 = vmatprep.subr.bf16.mxu0 %v3466_v31  ;;  %v3427_v31 = vld [vmem:[#allocation5 + $0x6ac] ss:$16 sps:$4 sm:$0xff]  }
 0x115   :  { %1906 = vmatpush1.bf16.msra.mxu1 %v3368_v32  ;;  %v3430_v32 = vld [vmem:[#allocation5 + $0x6cc] ss:$16 sps:$4 sm:$0xff]  }
 0x116   :  { %1907 = vmatprep.subr.bf16.mxu1 %v3373_v33 }
 0x117   :  { %2396 = vmatpush1.bf16.msra.mxu0 %v3464_v11  ;;  %v3502_v11 = vld [vmem:[#allocation7 + $0xe4] ss:$8 sps:$4 sm:$0xff]  }
 0x118   :  { %2397 = vmatprep.subr.bf16.mxu0 %v3469_v52  ;;  %v3500_v52 = vld [vmem:[#allocation7 + $0xe0] ss:$8 sps:$4 sm:$0xff]  }
 0x119   :  { %1908 = vmatpush1.bf16.msra.mxu1 %v3371_v34 }
 0x11a   :  { %1909 = vmatprep.subr.bf16.mxu1 %v3376_v35  ;;  %v3428_v35 = vld [vmem:[#allocation5 + $0x6c8] ss:$16 sps:$4 sm:$0xff]  }
 0x11b   :  { %2398 = vmatpush1.bf16.msra.mxu0 %v3467_v36 }
 0x11c   :  { %2399 = vmatprep.subr.bf16.mxu0 %v3472_v37  ;;  %v3433_v37 = vld [vmem:[#allocation5 + $0x6ec] ss:$16 sps:$4 sm:$0xff]  }
 0x11d   :  { %1910 = vmatpush1.bf16.msra.mxu1 %v3374_v38  ;;  %v3505_v38 = vld [vmem:[#allocation7 + $0xf4] ss:$8 sps:$4 sm:$0xff]  }
 0x11e   :  { %1911 = vmatprep.subr.bf16.mxu1 %v3379_v39  ;;  %v3431_v39 = vld [vmem:[#allocation5 + $0x6e8] ss:$16 sps:$4 sm:$0xff]  }
 0x11f   :  { %2400 = vmatpush1.bf16.msra.mxu0 %v3470_v40  ;;  %v3503_v40 = vld [vmem:[#allocation7 + $0xf0] ss:$8 sps:$4 sm:$0xff]  }
 0x120   :  { %2401 = vmatprep.subr.bf16.mxu0 %v3475_v41  ;;  %v3436_v41 = vld [vmem:[#allocation5 + $0x70c] ss:$16 sps:$4 sm:$0xff]  }
 0x121   :  { %1912 = vmatpush1.bf16.msra.mxu1 %v3377_v42  ;;  %v3434_v42 = vld [vmem:[#allocation5 + $0x708] ss:$16 sps:$4 sm:$0xff]  }
 0x122   :  { %1913 = vmatprep.subr.bf16.mxu1 %v3382_v43  ;;  %v3439_v43 = vld [vmem:[#allocation5 + $0x72c] ss:$16 sps:$4 sm:$0xff]  }
 0x123   :  { %2402 = vmatpush1.bf16.msra.mxu0 %v3473_v44  ;;  %v3508_v44 = vld [vmem:[#allocation7 + $0x104] ss:$8 sps:$4 sm:$0xff]  }
 0x124   :  { %2403 = vmatprep.subr.bf16.mxu0 %v3478_v45  ;;  %v3437_v45 = vld [vmem:[#allocation5 + $0x728] ss:$16 sps:$4 sm:$0xff]  }
 0x125   :  { %1914 = vmatpush1.bf16.msra.mxu1 %v3380_v46  ;;  %v3442_v46 = vld [vmem:[#allocation5 + $0x74c] ss:$16 sps:$4 sm:$0xff]  }
 0x126   :  { %1915 = vmatprep.subr.bf16.mxu1 %v3385_v47  ;;  %v3440_v47 = vld [vmem:[#allocation5 + $0x748] ss:$16 sps:$4 sm:$0xff]  }
 0x127   :  { %2404 = vmatpush1.bf16.msra.mxu0 %v3476_v48  ;;  %v3445_v48 = vld [vmem:[#allocation5 + $0x76c] ss:$16 sps:$4 sm:$0xff]  }
 0x128   :  { %2405 = vmatprep.subr.bf16.mxu0 %v3481_v49  ;;  %v3443_v49 = vld [vmem:[#allocation5 + $0x768] ss:$16 sps:$4 sm:$0xff]  }
 0x129   :  { %1916 = vmatpush1.bf16.msra.mxu1 %v3383_v50  ;;  %v3448_v50 = vld [vmem:[#allocation5 + $0x78c] ss:$16 sps:$4 sm:$0xff]  }
 0x12a   :  { %1917 = vmatprep.subr.bf16.mxu1 %v3388_v51  ;;  %v3446_v51 = vld [vmem:[#allocation5 + $0x788] ss:$16 sps:$4 sm:$0xff]  }
 0x12b   :  { %2406 = vmatpush1.bf16.msra.mxu0 %v3479_v53  ;;  %v3451_v53 = vld [vmem:[#allocation5 + $0x7ac] ss:$16 sps:$4 sm:$0xff]  }
 0x12c   :  { %2407 = vmatprep.subr.bf16.mxu0 %v3484_v54  ;;  %v3449_v54 = vld [vmem:[#allocation5 + $0x7a8] ss:$16 sps:$4 sm:$0xff]  }
 0x12d   :  { %1918 = vmatpush1.bf16.msra.mxu1 %v3386_v55  ;;  %v3454_v55 = vld [vmem:[#allocation5 + $0x7cc] ss:$16 sps:$4 sm:$0xff]  }
 0x12e   :  { %1919 = vmatprep.subr.bf16.mxu1 %v3391_v56  ;;  %v3452_v56 = vld [vmem:[#allocation5 + $0x7c8] ss:$16 sps:$4 sm:$0xff]  }
 0x12f   :  { %2408 = vmatpush1.bf16.msra.mxu0 %v3482_v57  ;;  %v3457_v57 = vld [vmem:[#allocation5 + $0x7ec] ss:$16 sps:$4 sm:$0xff]  }
 0x130   :  { %2409 = vmatprep.subr.bf16.mxu0 %v3487_v58  ;;  %v3455_v58 = vld [vmem:[#allocation5 + $0x7e8] ss:$16 sps:$4 sm:$0xff]  }
 0x131   :  { %1920 = vmatpush1.bf16.msra.mxu1 %v3389_v59  ;;  %v355_v59 = vlaneseq }
 0x132   :  { %1921 = vmatprep.subr.bf16.mxu1 %v3394_v60 }
 0x133   :  { %2410 = vmatpush1.bf16.msra.mxu0 %v3485_v61  ;;  %v3819_v60 = vshrl.u32 %v355_v59, 7 }
 0x134   :  { %2411 = vmatprep.subr.bf16.mxu0 %v3490_v62  ;;  %v3825_v62 = vld [vmem:[%s3862_s2] sm:$0xf] }
 0x135   :  { %1922 = vmatpush1.bf16.msra.mxu1 %v3392_v63  ;;  %v357_v61 = vsub.s32 0, %v3819_v60  ;;  %v361_v63 = vsub.s32 1, %v3819_v60  ;;  %v369_v59 = vsub.s32 3, %v3819_v60 }
 0x136   :  { %1923 = vmatprep.subr.bf16.mxu1 %v3397_v0 }
 0x137   :  { %2412 = vmatpush1.bf16.msra.mxu0 %v3488_v1  ;;  %v358_v0 = vrot.slane %v3825_v62, %v357_v61 }
 0x138   :  { %2413 = vmatprep.subr.bf16.mxu0 %v3493_v2 }
 0x139   :  { %1924 = vmatpush1.bf16.msra.mxu1 %v3395_v3 }
 0x13a   :  { %1925 = vmatprep.subr.bf16.mxu1 %v3400_v4 }
 0x13b   :  { %2414 = vmatpush1.bf16.msra.mxu0 %v3491_v5 }
 0x13c   :  { %2415 = vmatprep.subr.bf16.mxu0 %v3496_v6 }
 0x13d   :  { %1926 = vmatpush1.bf16.msra.mxu1 %v3398_v7 }
 0x13e   :  { %1927 = vmatprep.subr.bf16.mxu1 %v3403_v9 }
 0x13f   :  { %2416 = vmatpush1.bf16.msra.mxu0 %v3494_v10 }
 0x140   :  { %2417 = vmatprep.subr.bf16.mxu0 %v3499_v12 }
 0x141   :  { %1928 = vmatpush1.bf16.msra.mxu1 %v3401_v13 }
 0x142   :  { %1929 = vmatprep.subr.bf16.mxu1 %v3406_v14 }
 0x143   :  { %2418 = vmatpush1.bf16.msra.mxu0 %v3497_v15 }
 0x144   :  { %2419 = vmatprep.subr.bf16.mxu0 %v3502_v11  ;;  %v3518_v11 = vld [vmem:[#allocation7 + $0x140] ss:$8 sps:$4 sm:$0xff]  }
 0x145   :  { %1930 = vmatpush1.bf16.msra.mxu1 %v3404_v17  ;;  %v3506_v17 = vld [vmem:[#allocation7 + $0x100] ss:$8 sps:$4 sm:$0xff]  }
 0x146   :  { %1931 = vmatprep.subr.bf16.mxu1 %v3409_v18 }
 0x147   :  { %2420 = vmatpush1.bf16.msra.mxu0 %v3500_v52  ;;  %v3564_v52 = vld [vmem:[#allocation8 + $0x68] sm:$0xff]  }
 0x148   :  { %2421 = vmatprep.subr.bf16.mxu0 %v3505_v38  ;;  %v3524_v38 = vld [vmem:[#allocation7 + $0x160] ss:$8 sps:$4 sm:$0xff]  }
 0x149   :  { %1932 = vmatpush1.bf16.msra.mxu1 %v3407_v19  ;;  %v3511_v19 = vld [vmem:[#allocation7 + $0x114] ss:$8 sps:$4 sm:$0xff]  }
 0x14a   :  { %1942 = vmatprep.subr.bf16.mxu1 %v3412_v20  ;;  %v3554_v20 = vld [vmem:[#allocation8 + $0x40] sm:$0xff]  }
 0x14b   :  { %2422 = vmatpush1.bf16.msra.mxu0 %v3503_v40  ;;  %v3527_v40 = vld [vmem:[#allocation7 + $0x170] ss:$8 sps:$4 sm:$0xff]  }
 0x14c   :  { %1934 = vmatmul.mubr.bf16.vlgmr.msra.gmra.mrb[4].mxu1 %v3803_v16  ;;  %v3425_v16 = vld [vmem:[#allocation5 + $0x6a8] ss:$16 sps:$4 sm:$0xff]   ;;  %2432 = vmatprep.subr.bf16.mxu0 %v3508_v44 }
 0x14d   :  { %1943 = vmatpush1.bf16.msra.mxu1 %v3410_v21  ;;  %1974 = vmatprep.mubr.bf16.mxu1 %v3807_v24  ;;  %v3555_v21 = vld [vmem:[#allocation8] sm:$0xff]   ;;  %v3533_v44 = vld [vmem:[#allocation7 + $0x190] ss:$8 sps:$4 sm:$0xff]  }
 0x14e   :  { %1944 = vmatprep.subr.bf16.mxu1 %v3415_v22  ;;  %v3556_v22 = vld [vmem:[#allocation8 + $0x48] sm:$0xff]  }
 0x151   :  { %1945 = vmatpush1.bf16.msra.mxu1 %v3413_v25  ;;  %v3509_v25 = vld [vmem:[#allocation7 + $0x110] ss:$8 sps:$4 sm:$0xff]  }
 0x152   :  { %1946 = vmatprep.subr.bf16.mxu1 %v3418_v26  ;;  %v3514_v26 = vld [vmem:[#allocation7 + $0x124] ss:$8 sps:$4 sm:$0xff]  }
 0x155   :  { %1947 = vmatpush1.bf16.msra.mxu1 %v3416_v27  ;;  %v3557_v27 = vld [vmem:[#allocation8 + $0x8] sm:$0xff]  }
 0x156   :  { %1948 = vmatprep.subr.bf16.mxu1 %v3421_v28  ;;  %v3558_v28 = vld [vmem:[#allocation8 + $0x50] sm:$0xff]  }
 0x159   :  { %1949 = vmatpush1.bf16.msra.mxu1 %v3419_v29  ;;  %v3512_v29 = vld [vmem:[#allocation7 + $0x120] ss:$8 sps:$4 sm:$0xff]  }
 0x15a   :  { %1950 = vmatprep.subr.bf16.mxu1 %v3424_v8  ;;  %v3517_v8 = vld [vmem:[#allocation7 + $0x134] ss:$8 sps:$4 sm:$0xff]  }
 0x15d   :  { %1951 = vmatpush1.bf16.msra.mxu1 %v3422_v30  ;;  %v3559_v30 = vld [vmem:[#allocation8 + $0x10] sm:$0xff]  }
 0x15e   :  { %1952 = vmatprep.subr.bf16.mxu1 %v3427_v31  ;;  %v3560_v31 = vld [vmem:[#allocation8 + $0x58] sm:$0xff]  }
 0x15f   :  { %v1689_v33 = vpop.f32.mrb[0].mxu1 }
 0x160   :  { %v1691_v24 = vpop.f32.mrb[1].mxu1  ;;  %v1690_v1 = vadd.f32 %v1689_v33, %v358_v0  ;;  %v3561_v33 = vld [vmem:[#allocation8 + $0x18] sm:$0xff]  }
 0x161   :  { %v1693_v34 = vpop.f32.mrb[2].mxu1  ;;  %1953 = vmatpush1.bf16.msra.mxu1 %v3425_v16  ;;  %v3515_v16 = vld [vmem:[#allocation7 + $0x130] ss:$8 sps:$4 sm:$0xff]  }
 0x162   :  { %v1694_v36 = vpop.f32.mrb[3].mxu1  ;;  %1954 = vmatprep.subr.bf16.mxu1 %v3430_v32  ;;  %v3520_v32 = vld [vmem:[#allocation7 + $0x144] ss:$8 sps:$4 sm:$0xff]   ;;  %v3523_v34 = vld [vmem:[#allocation7 + $0x154] ss:$8 sps:$4 sm:$0xff]  }
 0x163   :  { %v3521_v36 = vld [vmem:[#allocation7 + $0x150] ss:$8 sps:$4 sm:$0xff]  }
 0x165   :  { %1955 = vmatpush1.bf16.msra.mxu1 %v3428_v35  ;;  %v3563_v35 = vld [vmem:[#allocation8 + $0x20] sm:$0xff]  }
 0x166   :  { %1956 = vmatprep.subr.bf16.mxu1 %v3433_v37  ;;  %v3526_v37 = vld [vmem:[#allocation7 + $0x164] ss:$8 sps:$4 sm:$0xff]  }
 0x169   :  { %1957 = vmatpush1.bf16.msra.mxu1 %v3431_v39  ;;  %v3529_v39 = vld [vmem:[#allocation7 + $0x174] ss:$8 sps:$4 sm:$0xff]  }
 0x16a   :  { %1958 = vmatprep.subr.bf16.mxu1 %v3436_v41  ;;  %v3532_v41 = vld [vmem:[#allocation7 + $0x184] ss:$8 sps:$4 sm:$0xff]  }
 0x16d   :  { %1959 = vmatpush1.bf16.msra.mxu1 %v3434_v42  ;;  %v3530_v42 = vld [vmem:[#allocation7 + $0x180] ss:$8 sps:$4 sm:$0xff]  }
 0x16e   :  { %1960 = vmatprep.subr.bf16.mxu1 %v3439_v43  ;;  %v3535_v43 = vld [vmem:[#allocation7 + $0x194] ss:$8 sps:$4 sm:$0xff]  }
 0x171   :  { %1961 = vmatpush1.bf16.msra.mxu1 %v3437_v45  ;;  %v3538_v45 = vld [vmem:[#allocation7 + $0x1a4] ss:$8 sps:$4 sm:$0xff]  }
 0x172   :  { %1962 = vmatprep.subr.bf16.mxu1 %v3442_v46  ;;  %v3536_v46 = vld [vmem:[#allocation7 + $0x1a0] ss:$8 sps:$4 sm:$0xff]  }
 0x175   :  { %1963 = vmatpush1.bf16.msra.mxu1 %v3440_v47  ;;  %v3541_v47 = vld [vmem:[#allocation7 + $0x1b4] ss:$8 sps:$4 sm:$0xff]  }
 0x176   :  { %1964 = vmatprep.subr.bf16.mxu1 %v3445_v48  ;;  %v3539_v48 = vld [vmem:[#allocation7 + $0x1b0] ss:$8 sps:$4 sm:$0xff]  }
 0x179   :  { %1965 = vmatpush1.bf16.msra.mxu1 %v3443_v49  ;;  %v3544_v49 = vld [vmem:[#allocation7 + $0x1c4] ss:$8 sps:$4 sm:$0xff]  }
 0x17a   :  { %1966 = vmatprep.subr.bf16.mxu1 %v3448_v50  ;;  %v3542_v50 = vld [vmem:[#allocation7 + $0x1c0] ss:$8 sps:$4 sm:$0xff]  }
 0x17d   :  { %1967 = vmatpush1.bf16.msra.mxu1 %v3446_v51  ;;  %v3547_v51 = vld [vmem:[#allocation7 + $0x1d4] ss:$8 sps:$4 sm:$0xff]  }
 0x17e   :  { %1968 = vmatprep.subr.bf16.mxu1 %v3451_v53  ;;  %v3545_v53 = vld [vmem:[#allocation7 + $0x1d0] ss:$8 sps:$4 sm:$0xff]  }
 0x181   :  { %1969 = vmatpush1.bf16.msra.mxu1 %v3449_v54  ;;  %v3550_v54 = vld [vmem:[#allocation7 + $0x1e4] ss:$8 sps:$4 sm:$0xff]  }
 0x182   :  { %1970 = vmatprep.subr.bf16.mxu1 %v3454_v55  ;;  %v3548_v55 = vld [vmem:[#allocation7 + $0x1e0] ss:$8 sps:$4 sm:$0xff]  }
 0x185   :  { %1971 = vmatpush1.bf16.msra.mxu1 %v3452_v56  ;;  %v3553_v56 = vld [vmem:[#allocation7 + $0x1f4] ss:$8 sps:$4 sm:$0xff]  }
 0x186   :  { %1972 = vmatprep.subr.bf16.mxu1 %v3457_v57  ;;  %v3551_v57 = vld [vmem:[#allocation7 + $0x1f0] ss:$8 sps:$4 sm:$0xff]  }
 0x189   :  { %1973 = vmatpush1.bf16.msra.mxu1 %v3455_v58  ;;  %v365_v58 = vsub.s32 2, %v3819_v60  ;;  %v2992_v60 = vld [vmem:[%s3866_s6] ss:$0 sm:$0xff] }
 0x18a   :  { %3009 = vmatprep.subr.bf16.mxu1 %v3554_v20  ;;  %v2059_v20 = vld [vmem:[%s3864_s4] sm:$0x3] }
 0x18b   :  { %v366_v0 = vrot.slane %v3825_v62, %v365_v58 }
 0x18c   :  { %1975 = vmatmul.mubr.bf16.vlgmr.msra.gmra.mrb[4].mxu1 %v3811_v23  ;;  %v362_v23 = vrot.slane %v3825_v62, %v361_v63 }
 0x18d   :  { %3010 = vmatpush3.bf16.msra.mxu1 %v3555_v21  ;;  %v2064_v21 = vrot.slane %v2059_v20, %v357_v61 }
 0x18e   :  { %v1692_v2 = vadd.f32 %v1691_v24, %v362_v23  ;;  %3011 = vmatprep.subr.bf16.mxu1 %v3556_v22  ;;  %v3562_v24 = vld [vmem:[#allocation8 + $0x60] sm:$0xff]   ;;  %v370_v23 = vrot.slane %v3825_v62, %v369_v59  ;;  %v3568_v62 = vld [vmem:[#allocation8 + $0x78] sm:$0xff]   ;;  %v2068_v22 = vrot.slane %v2059_v20, %v361_v63 }
 0x191   :  { %3012 = vmatpush3.bf16.msra.mxu1 %v3557_v27 }
 0x192   :  { %3013 = vmatprep.subr.bf16.mxu1 %v3558_v28 }
 0x195   :  { %3014 = vmatpush3.bf16.msra.mxu1 %v3559_v30 }
 0x196   :  { %3015 = vmatprep.subr.bf16.mxu1 %v3560_v31 }
 0x199   :  { %3016 = vmatpush3.bf16.msra.mxu1 %v3561_v33 }
 0x19a   :  { %3017 = vmatprep.subr.bf16.mxu1 %v3562_v24 }
 0x19d   :  { %3018 = vmatpush3.bf16.msra.mxu1 %v3563_v35 }
 0x19e   :  { %3019 = vmatprep.subr.bf16.mxu1 %v3564_v52 }
 0x1e0   :  { %v1812_v3 = vpop.f32.mrb[0].mxu0 }
 0x1e1   :  { %v3032_v4 = vadd.f32 %v1812_v3, %v1690_v1  ;;  %v1814_v5 = vpop.f32.mrb[1].mxu0 }
 0x1e2   :  { %v3034_v6 = vadd.f32 %v1814_v5, %v1692_v2  ;;  %v1816_v7 = vpop.f32.mrb[2].mxu0 }
 0x1e3   :  { %v1983_v9 = vmul.f32 0.2, %v3032_v4  ;;  %v1817_v10 = vpop.f32.mrb[3].mxu0 }
 0x1e4   :  { %v1984_v12 = vmul.f32 0.2, %v3034_v6 }
 0x1e5   :  { %v1987_v13 = vmax.f32 %v3032_v4, %v1983_v9 }
 0x1e6   :  { %v1988_v14 = vmax.f32 %v3034_v6, %v1984_v12 }
 0x1e7   :  { %v1991_v18 = vpack.c.bf16 %v1987_v13, %v1987_v13 }
 0x1e8   :  { %v1992_v15 = vpack.c.bf16 %v1988_v14, %v1988_v14 }
 0x1ea   :  { %2423 = vmatprep.mubr.bf16.mxu0 %v1992_v15  ;;  %v3565_v15 = vld [vmem:[#allocation8 + $0x28] sm:$0xff]  }
 0x1eb   :  { %2424 = vmatmul.mubr.bf16.vlgmr.msra.gmra.mrb[4].mxu0 %v1991_v18  ;;  %3020 = vmatpush3.bf16.msra.mxu1 %v3565_v15  ;;  %v3567_v18 = vld [vmem:[#allocation8 + $0x30] sm:$0xff]  }
 0x1ec   :  { %2433 = vmatpush1.bf16.msra.mxu0 %v3506_v17  ;;  %v3566_v17 = vld [vmem:[#allocation8 + $0x70] sm:$0xff]  }
 0x1ed   :  { %2434 = vmatprep.subr.bf16.mxu0 %v3511_v19  ;;  %3021 = vmatprep.subr.bf16.mxu1 %v3566_v17  ;;  %v3569_v19 = vld [vmem:[#allocation8 + $0x38] sm:$0xff]  }
 0x1ef   :  { %3022 = vmatpush3.bf16.msra.mxu1 %v3567_v18 }
 0x1f0   :  { %2435 = vmatpush1.bf16.msra.mxu0 %v3509_v25  ;;  %3023 = vmatprep.subr.bf16.mxu1 %v3568_v62 }
 0x1f1   :  { %2436 = vmatprep.subr.bf16.mxu0 %v3514_v26 }
 0x1f3   :  { %3024 = vmatpush3.bf16.msra.mxu1 %v3569_v19 }
 0x1f4   :  { %2437 = vmatpush1.bf16.msra.mxu0 %v3512_v29 }
 0x1f5   :  { %2438 = vmatprep.subr.bf16.mxu0 %v3517_v8 }
 0x1f8   :  { %2439 = vmatpush1.bf16.msra.mxu0 %v3515_v16 }
 0x1f9   :  { %2440 = vmatprep.subr.bf16.mxu0 %v3520_v32 }
 0x1fc   :  { %2441 = vmatpush1.bf16.msra.mxu0 %v3518_v11 }
 0x1fd   :  { %2442 = vmatprep.subr.bf16.mxu0 %v3523_v34 }
 0x200   :  { %2443 = vmatpush1.bf16.msra.mxu0 %v3521_v36 }
 0x201   :  { %2444 = vmatprep.subr.bf16.mxu0 %v3526_v37 }
 0x204   :  { %2445 = vmatpush1.bf16.msra.mxu0 %v3524_v38 }
 0x205   :  { %2446 = vmatprep.subr.bf16.mxu0 %v3529_v39 }
 0x208   :  { %2447 = vmatpush1.bf16.msra.mxu0 %v3527_v40 }
 0x209   :  { %2448 = vmatprep.subr.bf16.mxu0 %v3532_v41 }
 0x20c   :  { %2449 = vmatpush1.bf16.msra.mxu0 %v3530_v42 }
 0x20d   :  { %2450 = vmatprep.subr.bf16.mxu0 %v3535_v43 }
 0x210   :  { %2451 = vmatpush1.bf16.msra.mxu0 %v3533_v44 }
 0x211   :  { %2452 = vmatprep.subr.bf16.mxu0 %v3538_v45 }
 0x214   :  { %2453 = vmatpush1.bf16.msra.mxu0 %v3536_v46 }
 0x215   :  { %2454 = vmatprep.subr.bf16.mxu0 %v3541_v47 }
 0x218   :  { %2455 = vmatpush1.bf16.msra.mxu0 %v3539_v48 }
 0x219   :  { %2456 = vmatprep.subr.bf16.mxu0 %v3544_v49 }
 0x21c   :  { %2457 = vmatpush1.bf16.msra.mxu0 %v3542_v50 }
 0x21d   :  { %2458 = vmatprep.subr.bf16.mxu0 %v3547_v51 }
 0x220   :  { %2459 = vmatpush1.bf16.msra.mxu0 %v3545_v53 }
 0x221   :  { %2460 = vmatprep.subr.bf16.mxu0 %v3550_v54 }
 0x224   :  { %2461 = vmatpush1.bf16.msra.mxu0 %v3548_v55 }
 0x225   :  { %2462 = vmatprep.subr.bf16.mxu0 %v3553_v56 }
 0x228   :  { %2463 = vmatpush1.bf16.msra.mxu0 %v3551_v57 }
 0x25f   :  { %v1976_v1 = vpop.f32.mrb[4].mxu1 }
 0x260   :  { %v3035_v2 = vadd.f32 %v1976_v1, %v366_v0  ;;  %v1978_v3 = vpop.f32.mrb[5].mxu1 }
 0x261   :  { %v3036_v4 = vadd.f32 %v1978_v3, %v370_v23  ;;  %v1980_v5 = vpop.f32.mrb[6].mxu1 }
 0x262   :  { %v1985_v6 = vmul.f32 0.2, %v3035_v2  ;;  %v1981_v7 = vpop.f32.mrb[7].mxu1 }
 0x263   :  { %v1986_v9 = vmul.f32 0.2, %v3036_v4 }
 0x264   :  { %v1989_v10 = vmax.f32 %v3035_v2, %v1985_v6 }
 0x265   :  { %v1990_v12 = vmax.f32 %v3036_v4, %v1986_v9 }
 0x266   :  { %v1993_v14 = vpack.c.bf16 %v1989_v10, %v1989_v10 }
 0x267   :  { %v1994_v13 = vpack.c.bf16 %v1990_v12, %v1990_v12 }
 0x269   :  { %2464 = vmatprep.mubr.bf16.mxu0 %v1994_v13 }
 0x26a   :  { %2465 = vmatmul.mubr.bf16.vlgmr.msra.gmra.mrb[4].mxu0 %v1993_v14 }
 0x33d   :  { %v2466_v25 = vpop.f32.mrb[4].mxu0 }
 0x33e   :  { %v3037_v26 = vadd.f32 %v2466_v25, %v2064_v21  ;;  %v2468_v27 = vpop.f32.mrb[5].mxu0 }
 0x33f   :  { %v3038_v28 = vadd.f32 %v2468_v27, %v2068_v22  ;;  %v2470_v29 = vpop.f32.mrb[6].mxu0 }
 0x340   :  { %v2473_v8 = vmul.f32 0.2, %v3037_v26  ;;  %v2471_v30 = vpop.f32.mrb[7].mxu0 }
 0x341   :  { %v2474_v31 = vmul.f32 0.2, %v3038_v28 }
 0x342   :  { %v2475_v16 = vmax.f32 %v3037_v26, %v2473_v8 }
 0x343   :  { %v2476_v32 = vmax.f32 %v3038_v28, %v2474_v31 }
 0x344   :  { %v2477_v24 = vpack.c.bf16 %v2475_v16, %v2475_v16 }
 0x345   :  { %v2478_v33 = vpack.c.bf16 %v2476_v32, %v2476_v32 }
 0x347   :  { %2646 = vmatprep.mubr.bf16.mxu1 %v2478_v33 }
 0x348   :  { %2647 = vmatmul.mubr.bf16.vlgmr.msra.gmra.mrb[8].mxu1 %v2477_v24 }
 0x41b   :  { %v3025_v11 = vpop.f32.mrb[8].mxu1 }
 0x41c   :  { %v3026_v61 = vpop.f32.mrb[9].mxu1 }
 0x41d   :  { %v3027_v63 = vadd.f32 %v3026_v61, %v3025_v11  ;;  %v3028_v34 = vpop.f32.mrb[10].mxu1 }
 0x41e   :  { %v3029_v35 = vpop.f32.mrb[11].mxu1 }
 0x41f   :  { %v2649_v52 = vadd.f32 %v3027_v63, %v2992_v60 }
 0x421   :  { %2654 = vst [vmem:[#allocation10] sm:$0xff] %v2649_v52 }
 0x422   :  { %3669 = shalt.err (!%p3666_p8)
}
 0x423   :  { %s3670_s6 = scalar_lea.hbm %s3867_s7, 128 }
 0x424   :  { %p3671_p9 = scmp.ne.s32.totalorder %s3867_s7, %s3670_s6  ;;  %p3674_p10 = scmp.lt.u32.totalorder %s3670_s6, %s3867_s7 }
 0x426   :  { %p3676_p11 = pnand %p3674_p10, %p3671_p9 }
 0x428   :  { %3679 = shalt.err (!%p3676_p11)
}
 0x429   :  { %2664 = dma.vmem_to_hbm [thread:$0]  %s2662_s9, 128, %s3867_s7, [#allocation4]  }
 0x42a   :  { %3686 = dma.done.wait [#allocation4], 128  }
 0x42b   :  { %3687 = vsyncadd [#allocation4], 4294967168 }
 0x42c   :  { %2668 = vsyncpa [#allocation3], 1 }
 0x42d   :  { %2669 = vsyncpa [#allocation6], 1 }
 0x42e   :  { %2670 = vsyncpa [#allocation9], 1 }
 0x42f   :  { %2671 = vsyncpa [#allocation4], 1 }

</bundles_post_ra>
